<compile_context>
chip_gen: v6e
topology: v6e:2x2x1
jax: 0.10.0
libtpu: 0.0.40
codegen_flags: <defaults>
</compile_context>

<pallas_src>
import functools

import jax
import jax.numpy as jnp
import numpy as np
from jax.experimental import pallas as pl
from jax.experimental.pallas import tpu as pltpu


def _round_up(x, m):
    return ((x + m - 1) // m) * m


# ---------------------------------------------------------------------------
# Pallas kernel: per-edge MLPs + score/target math + per-tile loss partial sum
# ---------------------------------------------------------------------------
def _ddm_kernel(h_ref, pk_ref, wv_ref, w2h_ref, w2b_ref, ws_ref, out_ref, *,
                anneal_power, n_edges, tile_e, need_mask, d2):
    # packed per-edge scalars: columns = (distance, noise, sigma)
    pk = pk_ref[...]                                   # [TE, 3] f32
    dist = pk[:, 0:1]
    noise = pk[:, 1:2]
    sigma = pk[:, 2:3]

    if need_mask:
        row = jax.lax.broadcasted_iota(jnp.int32, (tile_e, 1), 0)
        valid = (pl.program_id(0) * tile_e + row) < n_edges
        dist = jnp.where(valid, dist, 0.0)
        noise = jnp.where(valid, noise, 0.0)
        sigma = jnp.where(valid, sigma, 1.0)           # keep 1/sigma finite on pads

    perturbed = dist + noise * sigma

    # packed parameter vectors (loaded once per tile, static sublane slices)
    wv = wv_ref[...]                                   # [5, D]
    w1a = wv[0:1, :]
    b1a = wv[1:2, :]
    w1b = wv[2:3, :]                                   # Linear(D,1) weight as row
    w2d = wv[3:4, :]                                   # row D of output_mlp layer-0 weight
    b2a = wv[4:5, :]                                   # already includes folded b1b*w2d
    ws = ws_ref[...]                                   # [3, D2]
    b2b = ws[0:1, :]
    w2c = ws[1:2, :]                                   # Linear(D2,1) weight as row
    b2c = ws[2:3, 0:1]                                 # scalar bias in lane 0

    # input_distance_mlp : Linear(1,D) -> relu -> Linear(D,1)   (VPU + lane reduce)
    x = jnp.maximum(perturbed * w1a + b1a, 0.0)                               # [TE, D]
    demb = jnp.sum(x * w1b, axis=-1, keepdims=True)                           # [TE, 1]

    # output_mlp : Linear(D+1,D) -> relu -> Linear(D,D/2) -> relu -> Linear(D/2,1)
    # cat([h_row + h_col, demb]) @ W == h_sum @ W[:D] + demb * W[D]
    h = h_ref[...]                                                            # [TE, D] bf16
    y1 = jnp.maximum(
        jnp.dot(h, w2h_ref[...], preferred_element_type=jnp.float32)
        + demb * w2d + b2a, 0.0)                                              # [TE, D]
    y2 = jnp.maximum(
        jnp.dot(y1, w2b_ref[...], preferred_element_type=jnp.float32)
        + b2b, 0.0)                                                           # [TE, D2]
    scores = jnp.sum(y2 * w2c, axis=-1, keepdims=True) + b2c                  # [TE, 1]

    inv_sigma = 1.0 / sigma
    scores = scores * inv_sigma
    target = -(perturbed - dist) * inv_sigma * inv_sigma

    if float(anneal_power) == 2.0:                     # static Python branch
        sigma_pow = sigma * sigma
    else:
        sigma_pow = jnp.exp(anneal_power * jnp.log(sigma))

    diff = scores - target
    loss = 0.5 * diff * diff * sigma_pow                                      # [TE, 1]
    if need_mask:
        loss = jnp.where(valid, loss, 0.0)

    # one partial sum per edge tile (grid axis is 'parallel' -> no shared acc)
    out_ref[...] = jnp.sum(loss).reshape(1, 1, 1)


# ---------------------------------------------------------------------------
# Wrapper
# ---------------------------------------------------------------------------
def geossl_ddm_pallas(h_sum, distance, noise, sigma_e, params, anneal_power,
                      num_graphs, max_tile_e=4096):
    E, D = h_sum.shape
    D2 = params["w2b"].shape[1]

    # tile size: multiple of 8 sublanes, capped by max_tile_e and a VMEM budget
    vmem_budget = 16 * 1024 * 1024                      # per-input double-buffer budget
    bytes_per_row = 2 * D + 3 * 4                       # h (bf16) + packed scalars (f32)
    cap = max(8, (vmem_budget // (2 * bytes_per_row)) // 8 * 8)
    tile_e = int(min(_round_up(E, 8), max_tile_e, cap))
    nt = (E + tile_e - 1) // tile_e
    need_mask = (E % tile_e) != 0                       # ragged last tile?

    # pack per-edge scalars into one lane-compact array: one DMA per tile
    packed = jnp.concatenate(
        [distance.astype(jnp.float32),
         noise.astype(jnp.float32),
         sigma_e.astype(jnp.float32)], axis=1)          # [E, 3]
    h_bf16 = h_sum.astype(jnp.bfloat16)                 # halve dominant HBM stream

    # --- pack parameters ----------------------------------------------------
    w1a = params["w1a"].reshape(1, D)
    b1a = params["b1a"].reshape(1, D)
    w1b = params["w1b"].reshape(1, D)                   # [D,1] column as row
    b1b = params["b1b"].reshape(1, 1)
    w2d = params["w2d"].reshape(1, D)
    b2a = params["b2a"].reshape(1, D) + b1b * w2d       # fold Linear(D,1) bias
    wvec_d = jnp.concatenate([w1a, b1a, w1b, w2d, b2a], axis=0)       # [5, D]

    b2b = params["b2b"].reshape(1, D2)
    w2c = params["w2c"].reshape(1, D2)                  # [D2,1] column as row
    b2c_row = jnp.concatenate(
        [params["b2c"].reshape(1, 1),
         jnp.zeros((1, D2 - 1), jnp.float32)], axis=1) if D2 > 1 \
        else params["b2c"].reshape(1, 1)
    wvec_d2 = jnp.concatenate([b2b, w2c, b2c_row], axis=0)            # [3, D2]

    w2h = params["w2h"].astype(jnp.bfloat16)            # [D, D]
    w2b = params["w2b"]                                 # [D, D2] f32

    edge_h_spec = pl.BlockSpec((tile_e, D), lambda i: (i, 0))
    edge_pk_spec = pl.BlockSpec((tile_e, 3), lambda i: (i, 0))

    def wspec(shape):
        return pl.BlockSpec(shape, lambda i: (0, 0))

    in_specs = [
        edge_h_spec, edge_pk_spec,
        wspec((5, D)),                                  # packed [1,D] vectors
        wspec((D, D)),                                  # w2h (bf16)
        wspec((D, D2)),                                 # w2b
        wspec((3, D2)),                                 # packed [1,D2] vectors + b2c
    ]

    partial_sums = pl.pallas_call(
        functools.partial(_ddm_kernel, anneal_power=float(anneal_power),
                          n_edges=E, tile_e=tile_e, need_mask=need_mask, d2=D2),
        out_shape=jax.ShapeDtypeStruct((nt, 1, 1), jnp.float32),
        grid_spec=pltpu.PrefetchScalarGridSpec(
            num_scalar_prefetch=0,
            grid=(nt,),
            in_specs=in_specs,
            out_specs=pl.BlockSpec((1, 1, 1), lambda i: (i, 0, 0)),
            scratch_shapes=[],
        ),
        compiler_params=pltpu.CompilerParams(
            dimension_semantics=("parallel",),
            vmem_limit_bytes=32 * 1024 * 1024),
    )(h_bf16, packed, wvec_d, w2h, w2b, wvec_d2)

    # scatter_add(loss, edge2graph).mean()  ==  sum(loss) / num_graphs
    return jnp.sum(partial_sums) / jnp.float32(num_graphs)


# ---------------------------------------------------------------------------
# Deterministic parameter init (xavier_uniform weights, zero biases)
# ---------------------------------------------------------------------------
def init_params(key, emb_dim):
    D, D2 = emb_dim, emb_dim // 2

    def xavier(k, fan_in, fan_out):
        a = np.sqrt(6.0 / (fan_in + fan_out))
        return jax.random.uniform(k, (fan_in, fan_out), jnp.float32, -a, a)

    ks = jax.random.split(key, 5)
    w2a_full = xavier(ks[2], D + 1, D)        # Linear(1 + emb_dim, emb_dim)
    return {
        "w1a": xavier(ks[0], 1, D), "b1a": jnp.zeros((1, D), jnp.float32),
        "w1b": xavier(ks[1], D, 1), "b1b": jnp.zeros((1, 1), jnp.float32),
        "w2h": w2a_full[:D, :], "w2d": w2a_full[D:, :],
        "b2a": jnp.zeros((1, D), jnp.float32),
        "w2b": xavier(ks[3], D, D2), "b2b": jnp.zeros((1, D2), jnp.float32),
        "w2c": xavier(ks[4], D2, 1), "b2c": jnp.zeros((1, 1), jnp.float32),
    }


# ---------------------------------------------------------------------------
# Pure-JAX reference (mirrors the PyTorch forward exactly, all-f32)
# ---------------------------------------------------------------------------
def reference(node_feature, distance, sei, node2graph, sigmas, noise_level,
              noise, params, anneal_power, num_graphs):
    edge2graph = node2graph[sei[0]]
    used = sigmas[noise_level][edge2graph][:, None]
    pert = distance + noise * used
    x = jax.nn.relu(pert @ params["w1a"] + params["b1a"])
    demb = x @ params["w1b"] + params["b1b"]
    target = -1.0 / used ** 2 * (pert - distance)
    h_row = node_feature[sei[0]]
    h_col = node_feature[sei[1]]
    feat = jnp.concatenate([h_row + h_col, demb], axis=-1)
    w2a_full = jnp.concatenate([params["w2h"], params["w2d"]], axis=0)
    y = jax.nn.relu(feat @ w2a_full + params["b2a"])
    y = jax.nn.relu(y @ params["w2b"] + params["b2b"])
    scores = (y @ params["w2c"] + params["b2c"]) * (1.0 / used)
    loss = 0.5 * (scores.reshape(-1) - target.reshape(-1)) ** 2 \
        * used.squeeze(-1) ** anneal_power
    per_graph = jax.ops.segment_sum(loss, edge2graph, num_segments=num_graphs)
    return per_graph.mean()


# ---------------------------------------------------------------------------
if __name__ == "__main__":
    emb_dim = 32
    sigma_begin, sigma_end, num_noise_level = 10.0, 0.01, 50
    anneal_power = 2.0
    num_graphs, nodes_per_graph = 4, 8
    N = num_graphs * nodes_per_graph

    key = jax.random.PRNGKey(0)
    k_param, k_feat, k_dist, k_lvl, k_noise = jax.random.split(key, 5)

    params = init_params(k_param, emb_dim)
    sigmas = jnp.asarray(
        np.exp(np.linspace(np.log(sigma_begin), np.log(sigma_end),
                           num_noise_level)), dtype=jnp.float32)

    # synthetic graph batch: dense intra-graph super edges (incl. self loops)
    node2graph = jnp.repeat(jnp.arange(num_graphs), nodes_per_graph)
    rows, cols = [], []
    for g in range(num_graphs):
        base = g * nodes_per_graph
        for a in range(nodes_per_graph):
            for b in range(nodes_per_graph):
                rows.append(base + a)
                cols.append(base + b)
    super_edge_index = jnp.asarray([rows, cols], dtype=jnp.int32)   # [2, E]
    E = super_edge_index.shape[1]                                   # 256

    node_feature = jax.random.normal(k_feat, (N, emb_dim), jnp.float32)
    distance = jax.random.uniform(k_dist, (E, 1), jnp.float32, 0.5, 5.0)

    # randomness of the forward pass, drawn deterministically outside the kernel
    # TODO(synk): torch.randint / torch.randn_like are host-side RNG; drawn here
    # with jax.random instead of inside the kernel.
    noise_level = jax.random.randint(k_lvl, (num_graphs,), 0, num_noise_level)
    distance_noise = jax.random.normal(k_noise, distance.shape, jnp.float32)

    # glue: gathers / per-edge sigma (pure indexing, no compute)
    edge2graph = node2graph[super_edge_index[0]]
    sigma_e = sigmas[noise_level][edge2graph][:, None]               # [E, 1]
    h_sum = (node_feature[super_edge_index[0]]
             + node_feature[super_edge_index[1]])                    # [E, D]

    loss = geossl_ddm_pallas(h_sum, distance, distance_noise, sigma_e,
                             params, anneal_power, num_graphs)
    loss = jax.block_until_ready(loss)

    ref = jax.block_until_ready(
        reference(node_feature, distance, super_edge_index, node2graph,
                  sigmas, noise_level, distance_noise, params,
                  anneal_power, num_graphs))

    np.testing.assert_allclose(np.asarray(loss), np.asarray(ref),
                               rtol=2e-2, atol=1e-3)
    print("KERNEL_OK")
</pallas_src>

<mosaic_0001>
module attributes {stable_mosaic.version = 11 : i64} {
  func.func @_ddm_kernel(%arg0: i32, %arg1: memref<256x32xbf16, #tpu.memory_space<vmem>>, %arg2: memref<256x3xf32, #tpu.memory_space<vmem>>, %arg3: memref<5x32xf32, #tpu.memory_space<vmem>>, %arg4: memref<32x32xbf16, #tpu.memory_space<vmem>>, %arg5: memref<32x16xf32, #tpu.memory_space<vmem>>, %arg6: memref<3x16xf32, #tpu.memory_space<vmem>>, %arg7: memref<1x1x1xf32, #tpu.memory_space<vmem>>) attributes {dimension_semantics = [#tpu.dimension_semantics<parallel>], iteration_bounds = array<i64: 1>, scalar_prefetch = 0 : i64, scratch_operands = 0 : i64, tpu.core_type = #tpu.core_type<tc>, window_params = [{transform_indices = @transform_0, window_bounds = array<i64: 256, 32>}, {transform_indices = @transform_1, window_bounds = array<i64: 256, 3>}, {pipeline_mode = #tpu.pipeline_mode<synchronous>, transform_indices = @transform_2, window_bounds = array<i64: 5, 32>}, {pipeline_mode = #tpu.pipeline_mode<synchronous>, transform_indices = @transform_3, window_bounds = array<i64: 32, 32>}, {pipeline_mode = #tpu.pipeline_mode<synchronous>, transform_indices = @transform_4, window_bounds = array<i64: 32, 16>}, {pipeline_mode = #tpu.pipeline_mode<synchronous>, transform_indices = @transform_5, window_bounds = array<i64: 3, 16>}, {transform_indices = @transform_6, window_bounds = array<i64: 1, 1, 1>}]} {
    %c0 = arith.constant 0 : index
    %c0_0 = arith.constant 0 : index
    %0 = vector.load %arg2[%c0, %c0_0] : memref<256x3xf32, #tpu.memory_space<vmem>>, vector<256x3xf32>
    %1 = vector.extract_strided_slice %0 {offsets = [0, 0], sizes = [256, 1], strides = [1, 1]} : vector<256x3xf32> to vector<256x1xf32>
    %2 = vector.extract_strided_slice %0 {offsets = [0, 1], sizes = [256, 1], strides = [1, 1]} : vector<256x3xf32> to vector<256x1xf32>
    %3 = vector.extract_strided_slice %0 {offsets = [0, 2], sizes = [256, 1], strides = [1, 1]} : vector<256x3xf32> to vector<256x1xf32>
    %4 = arith.mulf %2, %3 : vector<256x1xf32>
    %5 = arith.addf %1, %4 : vector<256x1xf32>
    %c0_1 = arith.constant 0 : index
    %c0_2 = arith.constant 0 : index
    %6 = vector.load %arg3[%c0_1, %c0_2] : memref<5x32xf32, #tpu.memory_space<vmem>>, vector<5x32xf32>
    %7 = vector.extract_strided_slice %6 {offsets = [0, 0], sizes = [1, 32], strides = [1, 1]} : vector<5x32xf32> to vector<1x32xf32>
    %8 = vector.extract_strided_slice %6 {offsets = [1, 0], sizes = [1, 32], strides = [1, 1]} : vector<5x32xf32> to vector<1x32xf32>
    %9 = vector.extract_strided_slice %6 {offsets = [2, 0], sizes = [1, 32], strides = [1, 1]} : vector<5x32xf32> to vector<1x32xf32>
    %10 = vector.extract_strided_slice %6 {offsets = [3, 0], sizes = [1, 32], strides = [1, 1]} : vector<5x32xf32> to vector<1x32xf32>
    %11 = vector.extract_strided_slice %6 {offsets = [4, 0], sizes = [1, 32], strides = [1, 1]} : vector<5x32xf32> to vector<1x32xf32>
    %c0_3 = arith.constant 0 : index
    %c0_4 = arith.constant 0 : index
    %12 = vector.load %arg6[%c0_3, %c0_4] : memref<3x16xf32, #tpu.memory_space<vmem>>, vector<3x16xf32>
    %13 = vector.extract_strided_slice %12 {offsets = [0, 0], sizes = [1, 16], strides = [1, 1]} : vector<3x16xf32> to vector<1x16xf32>
    %14 = vector.extract_strided_slice %12 {offsets = [1, 0], sizes = [1, 16], strides = [1, 1]} : vector<3x16xf32> to vector<1x16xf32>
    %15 = vector.extract_strided_slice %12 {offsets = [2, 0], sizes = [1, 1], strides = [1, 1]} : vector<3x16xf32> to vector<1x1xf32>
    %16 = vector.broadcast %5 : vector<256x1xf32> to vector<256x32xf32>
    %17 = vector.broadcast %7 : vector<1x32xf32> to vector<256x32xf32>
    %18 = arith.mulf %16, %17 : vector<256x32xf32>
    %19 = vector.broadcast %8 : vector<1x32xf32> to vector<256x32xf32>
    %20 = arith.addf %18, %19 : vector<256x32xf32>
    %cst = arith.constant 0.000000e+00 : f32
    %21 = vector.broadcast %cst : f32 to vector<256x32xf32>
    %22 = arith.maximumf %20, %21 : vector<256x32xf32>
    %23 = vector.broadcast %9 : vector<1x32xf32> to vector<256x32xf32>
    %24 = arith.mulf %22, %23 : vector<256x32xf32>
    %cst_5 = arith.constant dense<0.000000e+00> : vector<256xf32>
    %25 = vector.multi_reduction <add>, %24, %cst_5 [1] : vector<256x32xf32> to vector<256xf32>
    %26 = vector.shape_cast %25 : vector<256xf32> to vector<256x1xf32>
    %c0_6 = arith.constant 0 : index
    %c0_7 = arith.constant 0 : index
    %27 = vector.load %arg1[%c0_6, %c0_7] : memref<256x32xbf16, #tpu.memory_space<vmem>>, vector<256x32xbf16>
    %c0_8 = arith.constant 0 : index
    %c0_9 = arith.constant 0 : index
    %28 = vector.load %arg4[%c0_8, %c0_9] : memref<32x32xbf16, #tpu.memory_space<vmem>>, vector<32x32xbf16>
    %cst_10 = arith.constant dense<0.000000e+00> : vector<256x32xf32>
    %29 = tpu.matmul %27, %28, %cst_10 {dimension_numbers = #tpu.dot_dimension_numbers<[1], [0], [0], [1], [0, 0, 1, 1], [], []>} : vector<256x32xbf16>, vector<32x32xbf16>, vector<256x32xf32> -> vector<256x32xf32>
    %30 = vector.broadcast %26 : vector<256x1xf32> to vector<256x32xf32>
    %31 = vector.broadcast %10 : vector<1x32xf32> to vector<256x32xf32>
    %32 = arith.mulf %30, %31 : vector<256x32xf32>
    %33 = arith.addf %29, %32 : vector<256x32xf32>
    %34 = vector.broadcast %11 : vector<1x32xf32> to vector<256x32xf32>
    %35 = arith.addf %33, %34 : vector<256x32xf32>
    %cst_11 = arith.constant 0.000000e+00 : f32
    %36 = vector.broadcast %cst_11 : f32 to vector<256x32xf32>
    %37 = arith.maximumf %35, %36 : vector<256x32xf32>
    %c0_12 = arith.constant 0 : index
    %c0_13 = arith.constant 0 : index
    %38 = vector.load %arg5[%c0_12, %c0_13] : memref<32x16xf32, #tpu.memory_space<vmem>>, vector<32x16xf32>
    %cst_14 = arith.constant dense<0.000000e+00> : vector<256x16xf32>
    %39 = tpu.matmul %37, %38, %cst_14 {dimension_numbers = #tpu.dot_dimension_numbers<[1], [0], [0], [1], [0, 0, 1, 1], [], []>} : vector<256x32xf32>, vector<32x16xf32>, vector<256x16xf32> -> vector<256x16xf32>
    %40 = vector.broadcast %13 : vector<1x16xf32> to vector<256x16xf32>
    %41 = arith.addf %39, %40 : vector<256x16xf32>
    %cst_15 = arith.constant 0.000000e+00 : f32
    %42 = vector.broadcast %cst_15 : f32 to vector<256x16xf32>
    %43 = arith.maximumf %41, %42 : vector<256x16xf32>
    %44 = vector.broadcast %14 : vector<1x16xf32> to vector<256x16xf32>
    %45 = arith.mulf %43, %44 : vector<256x16xf32>
    %cst_16 = arith.constant dense<0.000000e+00> : vector<256xf32>
    %46 = vector.multi_reduction <add>, %45, %cst_16 [1] : vector<256x16xf32> to vector<256xf32>
    %47 = vector.shape_cast %46 : vector<256xf32> to vector<256x1xf32>
    %48 = vector.broadcast %15 : vector<1x1xf32> to vector<256x1xf32>
    %49 = arith.addf %47, %48 : vector<256x1xf32>
    %cst_17 = arith.constant 1.000000e+00 : f32
    %50 = vector.broadcast %cst_17 : f32 to vector<256x1xf32>
    %51 = arith.divf %50, %3 : vector<256x1xf32>
    %52 = arith.mulf %49, %51 : vector<256x1xf32>
    %53 = arith.subf %5, %1 : vector<256x1xf32>
    %cst_18 = arith.constant 0.000000e+00 : f32
    %54 = vector.broadcast %cst_18 : f32 to vector<256x1xf32>
    %55 = arith.subf %54, %53 : vector<256x1xf32>
    %56 = arith.mulf %55, %51 : vector<256x1xf32>
    %57 = arith.mulf %56, %51 : vector<256x1xf32>
    %58 = arith.mulf %3, %3 : vector<256x1xf32>
    %59 = arith.subf %52, %57 : vector<256x1xf32>
    %cst_19 = arith.constant 5.000000e-01 : f32
    %60 = vector.broadcast %cst_19 : f32 to vector<256x1xf32>
    %61 = arith.mulf %60, %59 : vector<256x1xf32>
    %62 = arith.mulf %61, %59 : vector<256x1xf32>
    %63 = arith.mulf %62, %58 : vector<256x1xf32>
    %64 = vector.shape_cast %63 : vector<256x1xf32> to vector<1x256x1xf32>
    %cst_20 = arith.constant dense<0.000000e+00> : vector<1xf32>
    %65 = vector.multi_reduction <add>, %64, %cst_20 [1, 2] : vector<1x256x1xf32> to vector<1xf32>
    %66 = vector.shape_cast %65 : vector<1xf32> to vector<1x1x1xf32>
    %67 = vector.extract %66[0, 0, 0] : f32 from vector<1x1x1xf32>
    %68 = vector.broadcast %67 : f32 to vector<1x1x1xf32>
    %c0_21 = arith.constant 0 : index
    %c0_22 = arith.constant 0 : index
    %c0_23 = arith.constant 0 : index
    %69 = vector.load %arg7[%c0_21, %c0_22, %c0_23] : memref<1x1x1xf32, #tpu.memory_space<vmem>>, vector<1x1x1xf32>
    tpu.vector_store %arg7[%c0_21, %c0_22, %c0_23], %68 {strides = array<i32>} : memref<1x1x1xf32, #tpu.memory_space<vmem>>, vector<1x1x1xf32>,
    return
  }
  func.func @transform_0(%arg0: i32) -> (i32, i32) {
    %c0_i32 = arith.constant 0 : i32
    %c0_i32_0 = arith.constant 0 : i32
    return %arg0, %c0_i32 : i32, i32
  }
  func.func @transform_1(%arg0: i32) -> (i32, i32) {
    %c0_i32 = arith.constant 0 : i32
    %c0_i32_0 = arith.constant 0 : i32
    return %arg0, %c0_i32 : i32, i32
  }
  func.func @transform_2(%arg0: i32) -> (i32, i32) {
    %c0_i32 = arith.constant 0 : i32
    %c0_i32_0 = arith.constant 0 : i32
    %c0_i32_1 = arith.constant 0 : i32
    return %c0_i32, %c0_i32_0 : i32, i32
  }
  func.func @transform_3(%arg0: i32) -> (i32, i32) {
    %c0_i32 = arith.constant 0 : i32
    %c0_i32_0 = arith.constant 0 : i32
    %c0_i32_1 = arith.constant 0 : i32
    return %c0_i32, %c0_i32_0 : i32, i32
  }
  func.func @transform_4(%arg0: i32) -> (i32, i32) {
    %c0_i32 = arith.constant 0 : i32
    %c0_i32_0 = arith.constant 0 : i32
    %c0_i32_1 = arith.constant 0 : i32
    return %c0_i32, %c0_i32_0 : i32, i32
  }
  func.func @transform_5(%arg0: i32) -> (i32, i32) {
    %c0_i32 = arith.constant 0 : i32
    %c0_i32_0 = arith.constant 0 : i32
    %c0_i32_1 = arith.constant 0 : i32
    return %c0_i32, %c0_i32_0 : i32, i32
  }
  func.func @transform_6(%arg0: i32) -> (i32, i32, i32) {
    %c0_i32 = arith.constant 0 : i32
    %c0_i32_0 = arith.constant 0 : i32
    %c0_i32_1 = arith.constant 0 : i32
    return %arg0, %c0_i32, %c0_i32_0 : i32, i32, i32
  }
}

</mosaic_0001>

<bundles_post_ra>
// kernel: tpu_custom_call.1
= control target key start
LH: loop header
LB: loop body
LE: loop exit
PB: predicated region body
PF: predicated region fallthrough
CT: control target
= control target key end

     0   :  { %s2843_s25 = smov 127   ;;  %s4515_s0 = inlined_call_operand.vmem [shape: bf16[256,32], index: 0, kind: input, shape index: {}]   ;;  %s4516_s1 = inlined_call_operand.vmem [shape: f32[256,3], index: 1, kind: input, shape index: {}]   ;;  %s4517_s2 = inlined_call_operand.vmem [shape: f32[5,32], index: 2, kind: input, shape index: {}]   ;;  %s4518_s3 = inlined_call_operand.vmem [shape: bf16[32,32], index: 3, kind: input, shape index: {}]   ;;  %s4519_s4 = inlined_call_operand.vmem [shape: f32[32,16], index: 4, kind: input, shape index: {}]   ;;  %s4520_s5 = inlined_call_operand.vmem [shape: f32[3,16], index: 5, kind: input, shape index: {}]   ;;  %s4521_s6 = inlined_call_operand.hbm [shape: f32[1,1,1], index: 6, kind: output, shape index: {}]  }
   0x1   :  { %v2885_v0 = vld [vmem:[%s4516_s1] sm:$0xff]  ;;  %v2890_v1 = vld [vmem:[%s4516_s1 + $0x10] sm:$0xff]  ;;  %v2899_v2 = vld [vmem:[%s4516_s1 + $0x8] sm:$0xff] }
   0x2   :  { %89 = vrot.lane.b32.xlu0 %v2885_v0, %s2843_s25  ;;  %93 = vrot.lane.b32.xlu1 %v2890_v1, %s2843_s25  ;;  %v2904_v3 = vld [vmem:[%s4516_s1 + $0x18] sm:$0xff]  ;;  %v2913_v4 = vld [vmem:[%s4516_s1 + $0x20] sm:$0xff] }
   0x3   :  { %v2918_v5 = vld [vmem:[%s4516_s1 + $0x28] sm:$0xff]  ;;  %v2927_v6 = vld [vmem:[%s4516_s1 + $0x30] sm:$0xff]  ;;  %v2932_v7 = vld [vmem:[%s4516_s1 + $0x38] sm:$0xff] }
   0x4   :  { %v2937_v8 = vld [vmem:[%s4516_s1 + $0x40] sm:$0xff]  ;;  %v2942_v9 = vld [vmem:[%s4516_s1 + $0x48] sm:$0xff]  ;;  %v2951_v10 = vld [vmem:[%s4516_s1 + $0x50] sm:$0xff] }
   0x5   :  { %v2956_v11 = vld [vmem:[%s4516_s1 + $0x58] sm:$0xff]  ;;  %v2965_v12 = vld [vmem:[%s4516_s1 + $0x60] sm:$0xff]  ;;  %v2970_v13 = vld [vmem:[%s4516_s1 + $0x68] sm:$0xff] }
   0x6   :  { %91 = vrot.lane.b32.xlu0 %v2899_v2, %s2843_s25  ;;  %95 = vrot.lane.b32.xlu1 %v2904_v3, %s2843_s25 }
   0xa   :  { %97 = vrot.lane.b32.xlu0 %v2913_v4, %s2843_s25  ;;  %99 = vrot.lane.b32.xlu1 %v2918_v5, %s2843_s25 }
   0xe   :  { %101 = vrot.lane.b32.xlu0 %v2927_v6, %s2843_s25  ;;  %103 = vrot.lane.b32.xlu1 %v2932_v7, %s2843_s25 }
  0x12   :  { %105 = vrot.lane.b32.xlu0 %v2937_v8, %s2843_s25  ;;  %107 = vrot.lane.b32.xlu1 %v2942_v9, %s2843_s25 }
  0x16   :  { %109 = vrot.lane.b32.xlu0 %v2951_v10, %s2843_s25  ;;  %111 = vrot.lane.b32.xlu1 %v2956_v11, %s2843_s25 }
  0x17   :  { %11 = vsyncpa [#allocation3], 0  ;;  %v2983_v14 = vld [vmem:[%s4516_s1 + $0x70] sm:$0xff]  ;;  %v2988_v15 = vld [vmem:[%s4516_s1 + $0x78] sm:$0xff]  ;;  %v2844_v32 = vmov 0   ;;  %2715 = vrcp.f32 %v2899_v2  ;;  %vm679_vm0 = vcmask 261120  }
  0x18   :  { %v2997_v16 = vld [vmem:[%s4516_s1 + $0x80] sm:$0xff]  ;;  %v3002_v17 = vld [vmem:[%s4516_s1 + $0x88] sm:$0xff]  ;;  %v3011_v18 = vld [vmem:[%s4516_s1 + $0x90] sm:$0xff]  ;;  %2695 = vset.pattern.permute.xlu1 %v2844_v32  ;;  %2696 = vset.pattern.permute.xlu0 %v2844_v32  ;;  %2717 = vrcp.f32 %v2885_v0  ;;  %s2845_s26 = smov 126   ;;  %vm1614_vm1 = vcmask 130048   ;;  %vm2387_vm2 = vcmask 7168  }
  0x19   :  { %v3016_v19 = vld [vmem:[%s4516_s1 + $0x98] sm:$0xff]  ;;  %v3025_v20 = vld [vmem:[%s4516_s1 + $0xa0] sm:$0xff]  ;;  %v3030_v21 = vld [vmem:[%s4516_s1 + $0xa8] sm:$0xff]  ;;  %2719 = vrcp.f32 %v2904_v3  ;;  %vm2461_vm3 = vcmask 0  }
  0x1a   :  { %113 = vrot.lane.b32.xlu0 %v2965_v12, %s2843_s25  ;;  %115 = vrot.lane.b32.xlu1 %v2970_v13, %s2843_s25  ;;  %v3039_v22 = vld [vmem:[%s4516_s1 + $0xb0] sm:$0xff]  ;;  %v3044_v23 = vld [vmem:[%s4516_s1 + $0xb8] sm:$0xff]  ;;  %2721 = vrcp.f32 %v2890_v1 }
  0x1b   :  { %v3053_v24 = vld [vmem:[%s4516_s1 + $0xc0] sm:$0xff]  ;;  %v3058_v25 = vld [vmem:[%s4516_s1 + $0xc8] sm:$0xff]  ;;  %v3067_v26 = vld [vmem:[%s4516_s1 + $0xd0] sm:$0xff]  ;;  %2723 = vrcp.f32 %v2913_v4 }
  0x1c   :  { %v3072_v27 = vld [vmem:[%s4516_s1 + $0xd8] sm:$0xff]  ;;  %v3081_v28 = vld [vmem:[%s4516_s1 + $0xe0] sm:$0xff]  ;;  %v3086_v29 = vld [vmem:[%s4516_s1 + $0xe8] sm:$0xff]  ;;  %2725 = vrcp.f32 %v2927_v6 }
  0x1d   :  { %v3095_v30 = vld [vmem:[%s4516_s1 + $0xf0] sm:$0xff]  ;;  %v3102_v31 = vld [vmem:[%s4516_s1 + $0xf8] sm:$0xff]  ;;  %2727 = vrcp.f32 %v2918_v5 }
  0x1e   :  { %117 = vrot.lane.b32.xlu0 %v2983_v14, %s2843_s25  ;;  %119 = vrot.lane.b32.xlu1 %v2988_v15, %s2843_s25  ;;  %2729 = vrcp.f32 %v2937_v8 }
  0x1f   :  { %2731 = vrcp.f32 %v2932_v7 }
  0x22   :  { %121 = vrot.lane.b32.xlu0 %v2997_v16, %s2843_s25  ;;  %123 = vrot.lane.b32.xlu1 %v3002_v17, %s2843_s25 }
  0x26   :  { %125 = vrot.lane.b32.xlu0 %v3011_v18, %s2843_s25  ;;  %127 = vrot.lane.b32.xlu1 %v3016_v19, %s2843_s25 }
  0x2a   :  { %129 = vrot.lane.b32.xlu0 %v3025_v20, %s2843_s25  ;;  %131 = vrot.lane.b32.xlu1 %v3030_v21, %s2843_s25 }
  0x2e   :  { %133 = vrot.lane.b32.xlu0 %v3039_v22, %s2843_s25  ;;  %135 = vrot.lane.b32.xlu1 %v3044_v23, %s2843_s25 }
  0x32   :  { %137 = vrot.lane.b32.xlu0 %v3053_v24, %s2843_s25  ;;  %139 = vrot.lane.b32.xlu1 %v3058_v25, %s2843_s25 }
  0x36   :  { %141 = vrot.lane.b32.xlu0 %v3067_v26, %s2843_s25  ;;  %143 = vrot.lane.b32.xlu1 %v3072_v27, %s2843_s25 }
  0x3a   :  { %145 = vrot.lane.b32.xlu0 %v3081_v28, %s2843_s25  ;;  %147 = vrot.lane.b32.xlu1 %v3086_v29, %s2843_s25 }
  0x3e   :  { %149 = vrot.lane.b32.xlu0 %v3095_v30, %s2843_s25 }
  0x42   :  { %151 = vrot.lane.b32.xlu0 %v3102_v31, %s2843_s25 }
  0x74   :  { %v90_v33 = vpop.permute.xlu0 %89  ;;  %v94_v34 = vpop.permute.xlu1 %93 }
  0x75   :  { %v185_v35 = vmul.f32 %v90_v33, %v2885_v0  ;;  %v187_v36 = vmul.f32 %v94_v34, %v2890_v1 }
  0x77   :  { %249 = vrot.lane.b32.xlu1 %v185_v35, %s2843_s25  ;;  %253 = vrot.lane.b32.xlu0 %v187_v36, %s2843_s25 }
  0x78   :  { %v92_v37 = vpop.permute.xlu0 %91  ;;  %v96_v38 = vpop.permute.xlu1 %95 }
  0x79   :  { %v186_v39 = vmul.f32 %v92_v37, %v2899_v2  ;;  %v188_v40 = vmul.f32 %v96_v38, %v2904_v3 }
  0x7b   :  { %251 = vrot.lane.b32.xlu1 %v186_v39, %s2843_s25 }
  0x7c   :  { %v98_v41 = vpop.permute.xlu0 %97  ;;  %v100_v42 = vpop.permute.xlu1 %99 }
  0x7d   :  { %v189_v43 = vmul.f32 %v98_v41, %v2913_v4  ;;  %v190_v44 = vmul.f32 %v100_v42, %v2918_v5 }
  0x7f   :  { %255 = vrot.lane.b32.xlu1 %v188_v40, %s2843_s25  ;;  %257 = vrot.lane.b32.xlu0 %v189_v43, %s2843_s25 }
  0x80   :  { %v102_v45 = vpop.permute.xlu0 %101  ;;  %v104_v46 = vpop.permute.xlu1 %103 }
  0x81   :  { %v191_v47 = vmul.f32 %v102_v45, %v2927_v6  ;;  %v192_v48 = vmul.f32 %v104_v46, %v2932_v7 }
  0x83   :  { %259 = vrot.lane.b32.xlu1 %v190_v44, %s2843_s25  ;;  %261 = vrot.lane.b32.xlu0 %v191_v47, %s2843_s25 }
  0x84   :  { %v106_v49 = vpop.permute.xlu0 %105  ;;  %v108_v50 = vpop.permute.xlu1 %107 }
  0x85   :  { %v193_v51 = vmul.f32 %v106_v49, %v2937_v8  ;;  %v194_v52 = vmul.f32 %v108_v50, %v2942_v9 }
  0x87   :  { %263 = vrot.lane.b32.xlu1 %v192_v48, %s2843_s25  ;;  %265 = vrot.lane.b32.xlu0 %v193_v51, %s2843_s25 }
  0x88   :  { %v110_v53 = vpop.permute.xlu0 %109  ;;  %v112_v54 = vpop.permute.xlu1 %111 }
  0x89   :  { %v195_v55 = vmul.f32 %v110_v53, %v2951_v10  ;;  %v196_v56 = vmul.f32 %v112_v54, %v2956_v11 }
  0x8b   :  { %267 = vrot.lane.b32.xlu1 %v194_v52, %s2843_s25  ;;  %269 = vrot.lane.b32.xlu0 %v195_v55, %s2843_s25 }
  0x8c   :  { %v114_v57 = vpop.permute.xlu0 %113  ;;  %v116_v58 = vpop.permute.xlu1 %115 }
  0x8d   :  { %v197_v59 = vmul.f32 %v114_v57, %v2965_v12  ;;  %v198_v60 = vmul.f32 %v116_v58, %v2970_v13  ;;  %v2697_v57 = vld [vmem:[%s4518_s3 + $0x8] sm:$0xff]  }
  0x8e   :  { %2597 = vmatprep.subr.bf16.mxu0 %v2697_v57 }
  0x8f   :  { %271 = vrot.lane.b32.xlu1 %v196_v56, %s2843_s25  ;;  %273 = vrot.lane.b32.xlu0 %v197_v59, %s2843_s25 }
  0x90   :  { %v118_v61 = vpop.permute.xlu0 %117  ;;  %v120_v62 = vpop.permute.xlu1 %119  ;;  %2598 = vmatpush3.bf16.msra.mxu0 %v2697_v57 }
  0x91   :  { %v199_v63 = vmul.f32 %v118_v61, %v2983_v14  ;;  %v200_v32 = vmul.f32 %v120_v62, %v2988_v15  ;;  %v2698_v62 = vld [vmem:[%s4518_s3] sm:$0xff]  }
  0x92   :  { %2599 = vmatprep.subr.bf16.mxu0 %v2698_v62 }
  0x93   :  { %275 = vrot.lane.b32.xlu1 %v198_v60, %s2843_s25  ;;  %277 = vrot.lane.b32.xlu0 %v199_v63, %s2843_s25 }
  0x94   :  { %v122_v33 = vpop.permute.xlu0 %121  ;;  %v124_v34 = vpop.permute.xlu1 %123  ;;  %2600 = vmatpush3.bf16.msra.mxu0 %v2698_v62 }
  0x95   :  { %v201_v35 = vmul.f32 %v122_v33, %v2997_v16  ;;  %v202_v36 = vmul.f32 %v124_v34, %v3002_v17  ;;  %v2699_v33 = vld [vmem:[%s4515_s0] sm:$0xff]   ;;  %v2700_v34 = vld [vmem:[%s4515_s0 + $0x8] sm:$0xff]  }
  0x96   :  { %2601 = vmatprep.mubr.msk.bf16.mxu0 %vm679_vm0, %v2699_v33 }
  0x97   :  { %279 = vrot.lane.b32.xlu1 %v200_v32, %s2843_s25  ;;  %281 = vrot.lane.b32.xlu0 %v201_v35, %s2843_s25  ;;  %v2716_v35 = vpop.eup %2715 }
  0x98   :  { %v126_v37 = vpop.permute.xlu0 %125  ;;  %v128_v38 = vpop.permute.xlu1 %127  ;;  %2602 = vmatmul.mubr.msk.bf16.vlgmr.msra.gmra.mxu0 %vm679_vm0, %v2700_v34 }
  0x99   :  { %v203_v39 = vmul.f32 %v126_v37, %v3011_v18  ;;  %v204_v40 = vmul.f32 %v128_v38, %v3016_v19  ;;  %v2701_v37 = vld [vmem:[%s4515_s0 + $0x10] sm:$0xff]  }
  0x9a   :  { %2605 = vmatprep.mubr.msk.bf16.mxu0 %vm679_vm0, %v2701_v37 }
  0x9b   :  { %283 = vrot.lane.b32.xlu1 %v202_v36, %s2843_s25  ;;  %285 = vrot.lane.b32.xlu0 %v203_v39, %s2843_s25  ;;  %v2718_v39 = vpop.eup %2717 }
  0x9c   :  { %v130_v41 = vpop.permute.xlu0 %129  ;;  %v132_v42 = vpop.permute.xlu1 %131 }
  0x9d   :  { %v205_v43 = vmul.f32 %v130_v41, %v3025_v20  ;;  %v206_v44 = vmul.f32 %v132_v42, %v3030_v21  ;;  %v2702_v41 = vld [vmem:[%s4515_s0 + $0x18] sm:$0xff]   ;;  %v2703_v42 = vld [vmem:[%s4515_s0 + $0x20] sm:$0xff]  }
  0x9f   :  { %287 = vrot.lane.b32.xlu1 %v204_v40, %s2843_s25  ;;  %289 = vrot.lane.b32.xlu0 %v205_v43, %s2843_s25  ;;  %v2720_v40 = vpop.eup %2719 }
  0xa0   :  { %v134_v45 = vpop.permute.xlu0 %133  ;;  %v136_v46 = vpop.permute.xlu1 %135  ;;  %2606 = vmatmul.mubr.msk.bf16.gmra.mxu0 %vm679_vm0, %v2702_v41 }
  0xa1   :  { %v207_v47 = vmul.f32 %v134_v45, %v3039_v22  ;;  %v208_v48 = vmul.f32 %v136_v46, %v3044_v23  ;;  %v2722_v43 = vpop.eup %2721  ;;  %2609 = vmatprep.mubr.msk.bf16.mxu0 %vm679_vm0, %v2703_v42  ;;  %v2705_v45 = vld [vmem:[%s4515_s0 + $0x30] sm:$0xff]   ;;  %v2706_v46 = vld [vmem:[%s4515_s0 + $0x38] sm:$0xff]  }
  0xa3   :  { %291 = vrot.lane.b32.xlu1 %v206_v44, %s2843_s25  ;;  %293 = vrot.lane.b32.xlu0 %v207_v47, %s2843_s25  ;;  %v2704_v44 = vld [vmem:[%s4515_s0 + $0x28] sm:$0xff]   ;;  %v2707_v47 = vld [vmem:[%s4515_s0 + $0x40] sm:$0xff]  }
  0xa4   :  { %v138_v49 = vpop.permute.xlu0 %137  ;;  %v140_v50 = vpop.permute.xlu1 %139 }
  0xa5   :  { %v209_v51 = vmul.f32 %v138_v49, %v3053_v24  ;;  %v210_v52 = vmul.f32 %v140_v50, %v3058_v25  ;;  %v2709_v49 = vld [vmem:[%s4515_s0 + $0x50] sm:$0xff]   ;;  %v2710_v50 = vld [vmem:[%s4515_s0 + $0x58] sm:$0xff]  }
  0xa7   :  { %295 = vrot.lane.b32.xlu1 %v208_v48, %s2843_s25  ;;  %297 = vrot.lane.b32.xlu0 %v209_v51, %s2843_s25  ;;  %v2708_v48 = vld [vmem:[%s4515_s0 + $0x48] sm:$0xff]   ;;  %v2711_v51 = vld [vmem:[%s4515_s0 + $0x60] sm:$0xff]  }
  0xa8   :  { %v142_v53 = vpop.permute.xlu0 %141  ;;  %v144_v54 = vpop.permute.xlu1 %143  ;;  %2610 = vmatmul.mubr.msk.bf16.gmra.mxu0 %vm679_vm0, %v2704_v44 }
  0xa9   :  { %v211_v55 = vmul.f32 %v142_v53, %v3067_v26  ;;  %v212_v56 = vmul.f32 %v144_v54, %v3072_v27  ;;  %2613 = vmatprep.mubr.msk.bf16.mxu0 %vm679_vm0, %v2705_v45 }
  0xab   :  { %299 = vrot.lane.b32.xlu1 %v210_v52, %s2843_s25  ;;  %301 = vrot.lane.b32.xlu0 %v211_v55, %s2843_s25  ;;  %v2712_v52 = vld [vmem:[%s4515_s0 + $0x68] sm:$0xff]  }
  0xac   :  { %v146_v58 = vpop.permute.xlu0 %145  ;;  %v148_v59 = vpop.permute.xlu1 %147 }
  0xad   :  { %v213_v60 = vmul.f32 %v146_v58, %v3081_v28  ;;  %v214_v61 = vmul.f32 %v148_v59, %v3086_v29  ;;  %v2713_v59 = vld [vmem:[%s4515_s0 + $0x70] sm:$0xff]  }
  0xaf   :  { %303 = vrot.lane.b32.xlu1 %v212_v56, %s2843_s25  ;;  %305 = vrot.lane.b32.xlu0 %v213_v60, %s2843_s25  ;;  %v2714_v60 = vld [vmem:[%s4515_s0 + $0x78] sm:$0xff]  }
  0xb0   :  { %v150_v63 = vpop.permute.xlu0 %149  ;;  %2614 = vmatmul.mubr.msk.bf16.gmra.mxu0 %vm679_vm0, %v2706_v46 }
  0xb1   :  { %v215_v32 = vmul.f32 %v150_v63, %v3095_v30  ;;  %2617 = vmatprep.mubr.msk.bf16.mxu0 %vm679_vm0, %v2707_v47 }
  0xb3   :  { %307 = vrot.lane.b32.xlu1 %v214_v61, %s2843_s25  ;;  %309 = vrot.lane.b32.xlu0 %v215_v32, %s2843_s25 }
  0xb4   :  { %v152_v36 = vpop.permute.xlu0 %151 }
  0xb5   :  { %v216_v38 = vmul.f32 %v152_v36, %v3102_v31 }
  0xb7   :  { %1845 = vrot.lane.b32.xlu1 %v2716_v35, %s2845_s26  ;;  %311 = vrot.lane.b32.xlu0 %v216_v38, %s2843_s25 }
  0xb8   :  { %2618 = vmatmul.mubr.msk.bf16.gmra.mxu0 %vm679_vm0, %v2708_v48 }
  0xb9   :  { %2621 = vmatprep.mubr.msk.bf16.mxu0 %vm679_vm0, %v2709_v49 }
  0xbb   :  { %1849 = vrot.lane.b32.xlu1 %v2720_v40, %s2845_s26  ;;  %1843 = vrot.lane.b32.xlu0 %v2718_v39, %s2845_s26 }
  0xbf   :  { %1847 = vrot.lane.b32.xlu0 %v2722_v43, %s2845_s26 }
  0xc0   :  { %2622 = vmatmul.mubr.msk.bf16.gmra.mxu0 %vm679_vm0, %v2710_v50 }
  0xc1   :  { %2625 = vmatprep.mubr.msk.bf16.mxu0 %vm679_vm0, %v2711_v51 }
  0xc8   :  { %2626 = vmatmul.mubr.msk.bf16.gmra.mxu0 %vm679_vm0, %v2712_v52 }
  0xc9   :  { %2629 = vmatprep.mubr.msk.bf16.mxu0 %vm679_vm0, %v2713_v59 }
  0xd0   :  { %2630 = vmatmul.mubr.msk.bf16.gmra.mxu0 %vm679_vm0, %v2714_v60 }
  0xe9   :  { %v250_v53 = vpop.permute.xlu1 %249  ;;  %v254_v54 = vpop.permute.xlu0 %253 }
  0xea   :  { %v3240_v55 = vadd.f32 %v250_v53, %v2885_v0  ;;  %v3243_v56 = vadd.f32 %v254_v54, %v2890_v1 }
  0xec   :  { %381 = vperm.xlu1 %2695, %v3240_v55   ;;  %391 = vperm.xlu0 %2696, %v3243_v56  }
  0xed   :  { %v252_v57 = vpop.permute.xlu1 %251 }
  0xee   :  { %v3249_v58 = vadd.f32 %v252_v57, %v2899_v2 }
  0xf0   :  { %386 = vperm.xlu1 %2695, %v3249_v58  }
  0xf1   :  { %v256_v61 = vpop.permute.xlu1 %255  ;;  %v258_v62 = vpop.permute.xlu0 %257 }
  0xf2   :  { %v3260_v63 = vadd.f32 %v256_v61, %v2904_v3  ;;  %v3264_v32 = vadd.f32 %v258_v62, %v2913_v4 }
  0xf4   :  { %396 = vperm.xlu1 %2695, %v3260_v63  }
  0xf5   :  { %v260_v33 = vpop.permute.xlu1 %259  ;;  %v262_v34 = vpop.permute.xlu0 %261 }
  0xf6   :  { %v3268_v35 = vadd.f32 %v260_v33, %v2918_v5  ;;  %v3271_v36 = vadd.f32 %v262_v34, %v2927_v6 }
  0xf8   :  { %401 = vperm.xlu1 %2695, %v3264_v32   ;;  %406 = vperm.xlu0 %2696, %v3268_v35  }
  0xf9   :  { %v264_v3 = vpop.permute.xlu1 %263  ;;  %v266_v37 = vpop.permute.xlu0 %265 }
  0xfa   :  { %v3276_v38 = vadd.f32 %v264_v3, %v2932_v7  ;;  %v3279_v39 = vadd.f32 %v266_v37, %v2937_v8  ;;  %v2100_v8 = vmul.f32 %v2899_v2, %v2899_v2  ;;  %v2099_v7 = vmul.f32 %v2885_v0, %v2885_v0 }
  0xfb   :  { %v539_v2 = vlaneseq }
  0xfc   :  { %411 = vperm.xlu1 %2695, %v3271_v36   ;;  %416 = vperm.xlu0 %2696, %v3276_v38  }
  0xfd   :  { %v268_v40 = vpop.permute.xlu1 %267  ;;  %v270_v41 = vpop.permute.xlu0 %269 }
  0xfe   :  { %v3284_v42 = vadd.f32 %v268_v40, %v2942_v9  ;;  %v3287_v43 = vadd.f32 %v270_v41, %v2951_v10  ;;  %v2101_v41 = vmul.f32 %v2890_v1, %v2890_v1 }
 0x100   :  { %421 = vperm.xlu1 %2695, %v3279_v39   ;;  %426 = vperm.xlu0 %2696, %v3284_v42  }
 0x101   :  { %v272_v44 = vpop.permute.xlu1 %271  ;;  %v274_v45 = vpop.permute.xlu0 %273 }
 0x102   :  { %v3292_v46 = vadd.f32 %v272_v44, %v2956_v11  ;;  %v3295_v47 = vadd.f32 %v274_v45, %v2965_v12  ;;  %v3395_v44 = vshrl.u32 %v539_v2, 7 }
 0x104   :  { %431 = vperm.xlu1 %2695, %v3287_v43   ;;  %436 = vperm.xlu0 %2696, %v3292_v46   ;;  %v4524_v0 = vsub.s32 0, %v3395_v44 }
 0x105   :  { %v276_v9 = vpop.permute.xlu1 %275  ;;  %v278_v48 = vpop.permute.xlu0 %277 }
 0x106   :  { %v3300_v10 = vadd.f32 %v276_v9, %v2970_v13  ;;  %v3303_v49 = vadd.f32 %v278_v48, %v2983_v14  ;;  %v3405_v48 = vld [vmem:[%s4517_s2] sm:$0x1f] }
 0x108   :  { %4552 = vst [vmem:[#allocation5_spill] sm:$0xff] %v3300_v10  ;;  %441 = vperm.xlu1 %2695, %v3295_v47   ;;  %446 = vperm.xlu0 %2696, %v3300_v10  }
 0x109   :  { %v280_v11 = vpop.permute.xlu1 %279  ;;  %v282_v50 = vpop.permute.xlu0 %281 }
 0x10a   :  { %v3308_v12 = vadd.f32 %v280_v11, %v2988_v15  ;;  %v3311_v51 = vadd.f32 %v282_v50, %v2997_v16  ;;  %v4523_v11 = vsub.s32 1, %v3395_v44 }
 0x10c   :  { %4553 = vst [vmem:[#allocation6_spill] sm:$0xff] %v3308_v12  ;;  %4554 = vst [vmem:[#allocation7_spill] sm:$0xff] %v3311_v51  ;;  %451 = vperm.xlu1 %2695, %v3303_v49   ;;  %456 = vperm.xlu0 %2696, %v3308_v12  }
 0x10d   :  { %v284_v13 = vpop.permute.xlu1 %283  ;;  %v286_v52 = vpop.permute.xlu0 %285 }
 0x10e   :  { %v3316_v14 = vadd.f32 %v284_v13, %v3002_v17  ;;  %v3319_v53 = vadd.f32 %v286_v52, %v3011_v18  ;;  %v3415_v13 = vrot.slane %v3405_v48, %v4524_v0  ;;  %v3420_v52 = vrot.slane %v3405_v48, %v4523_v11  ;;  %v3676_v11 = vld [vmem:[%s4516_s1 + $0x40] sm:$0xff] }
 0x110   :  { %4555 = vst [vmem:[#allocation8_spill] sm:$0xff] %v3316_v14  ;;  %4556 = vst [vmem:[#allocation9_spill] sm:$0xff] %v3319_v53  ;;  %461 = vperm.xlu1 %2695, %v3311_v51   ;;  %466 = vperm.xlu0 %2696, %v3316_v14  }
 0x111   :  { %v288_v15 = vpop.permute.xlu1 %287  ;;  %v290_v54 = vpop.permute.xlu0 %289 }
 0x112   :  { %v3324_v16 = vadd.f32 %v288_v15, %v3016_v19  ;;  %v3327_v57 = vadd.f32 %v290_v54, %v3025_v20  ;;  %v4522_v15 = vsub.s32 2, %v3395_v44 }
 0x114   :  { %4557 = vst [vmem:[#allocation10_spill] sm:$0xff] %v3324_v16  ;;  %4558 = vst [vmem:[#allocation11_spill] sm:$0xff] %v3327_v57  ;;  %471 = vperm.xlu1 %2695, %v3319_v53   ;;  %476 = vperm.xlu0 %2696, %v3324_v16  }
 0x115   :  { %v292_v17 = vpop.permute.xlu1 %291  ;;  %v294_v59 = vpop.permute.xlu0 %293 }
 0x116   :  { %v3332_v18 = vadd.f32 %v292_v17, %v3030_v21  ;;  %v3335_v60 = vadd.f32 %v294_v59, %v3039_v22 }
 0x118   :  { %4559 = vst [vmem:[#allocation12_spill] sm:$0xff] %v3332_v18  ;;  %4560 = vst [vmem:[#allocation13_spill] sm:$0xff] %v3335_v60  ;;  %481 = vperm.xlu1 %2695, %v3327_v57   ;;  %486 = vperm.xlu0 %2696, %v3332_v18  }
 0x119   :  { %v296_v19 = vpop.permute.xlu1 %295  ;;  %v298_v61 = vpop.permute.xlu0 %297 }
 0x11a   :  { %v3340_v20 = vadd.f32 %v296_v19, %v3044_v23  ;;  %v3343_v62 = vadd.f32 %v298_v61, %v3053_v24 }
 0x11c   :  { %4561 = vst [vmem:[#allocation14_spill] sm:$0xff] %v3340_v20  ;;  %4562 = vst [vmem:[#allocation15_spill] sm:$0xff] %v3343_v62  ;;  %491 = vperm.xlu1 %2695, %v3335_v60   ;;  %496 = vperm.xlu0 %2696, %v3340_v20  }
 0x11d   :  { %v300_v21 = vpop.permute.xlu1 %299  ;;  %v302_v33 = vpop.permute.xlu0 %301 }
 0x11e   :  { %v3348_v22 = vadd.f32 %v300_v21, %v3058_v25  ;;  %v3353_v34 = vadd.f32 %v302_v33, %v3067_v26  ;;  %v3429_v21 = vrot.slane %v3405_v48, %v4522_v15 }
 0x120   :  { %4563 = vst [vmem:[#allocation16_spill] sm:$0xff] %v3348_v22  ;;  %4564 = vst [vmem:[#allocation17_spill] sm:$0xff] %v3353_v34  ;;  %501 = vperm.xlu1 %2695, %v3343_v62   ;;  %506 = vperm.xlu0 %2696, %v3348_v22  }
 0x121   :  { %v304_v23 = vpop.permute.xlu1 %303  ;;  %v306_v24 = vpop.permute.xlu0 %305 }
 0x122   :  { %v3358_v3 = vadd.f32 %v304_v23, %v3072_v27  ;;  %v3362_v25 = vadd.f32 %v306_v24, %v3081_v28  ;;  %v2724_v28 = vpop.eup %2723 }
 0x124   :  { %4565 = vst [vmem:[#allocation18_spill] sm:$0xff] %v3358_v3  ;;  %4566 = vst [vmem:[#allocation19_spill] sm:$0xff] %v3362_v25  ;;  %511 = vperm.xlu1 %2695, %v3353_v34   ;;  %516 = vperm.xlu0 %2696, %v3358_v3  }
 0x125   :  { %v308_v4 = vpop.permute.xlu1 %307  ;;  %v310_v6 = vpop.permute.xlu0 %309 }
 0x126   :  { %v3367_v26 = vadd.f32 %v308_v4, %v3086_v29  ;;  %v3371_v37 = vadd.f32 %v310_v6, %v3095_v30  ;;  %v2726_v29 = vpop.eup %2725 }
 0x127   :  { %v2728_v30 = vpop.eup %2727 }
 0x128   :  { %4567 = vst [vmem:[#allocation20_spill] sm:$0xff] %v3367_v26  ;;  %4568 = vst [vmem:[#allocation21_spill] sm:$0xff] %v3371_v37  ;;  %521 = vperm.xlu1 %2695, %v3362_v25   ;;  %526 = vperm.xlu0 %2696, %v3367_v26  }
 0x129   :  { %v312_v5 = vpop.permute.xlu0 %311  ;;  %v3397_v45 = vpop.permute.xlu1 %1845 }
 0x12a   :  { %v3376_v27 = vadd.f32 %v312_v5, %v3102_v31  ;;  %v2730_v31 = vpop.eup %2729 }
 0x12b   :  { %v2732_v40 = vpop.eup %2731 }
 0x12c   :  { %4569 = vst [vmem:[#allocation22_spill] sm:$0xff] %v3376_v27  ;;  %531 = vperm.xlu1 %2695, %v3371_v37   ;;  %536 = vperm.xlu0 %2696, %v3376_v27  }
 0x12d   :  { %v3399_v9 = vpop.permute.xlu0 %1843  ;;  %v3408_v50 = vpop.permute.xlu1 %1849 }
 0x130   :  { %1855 = vrot.lane.b32.xlu1 %v2726_v29, %s2845_s26  ;;  %1851 = vrot.lane.b32.xlu0 %v2724_v28, %s2845_s26 }
 0x131   :  { %v3410_v1 = vpop.permute.xlu0 %1847 }
 0x134   :  { %2261 = vrot.lane.b32.xlu1 %v2100_v8, %s2845_s26  ;;  %1853 = vrot.lane.b32.xlu0 %v2728_v30, %s2845_s26 }
 0x138   :  { %1859 = vrot.lane.b32.xlu1 %v2730_v31, %s2845_s26  ;;  %2259 = vrot.lane.b32.xlu0 %v2099_v7, %s2845_s26 }
 0x13c   :  { %1857 = vrot.lane.b32.xlu0 %v2732_v40, %s2845_s26 }
 0x140   :  { %2263 = vrot.lane.b32.xlu0 %v2101_v41, %s2845_s26 }
 0x167   :  { %v382_v54 = vpop.permute.xlu1 %381  ;;  %v392_v17 = vpop.permute.xlu0 %391 }
 0x168   :  { %v543_v59 = vmul.f32 %v3415_v13, %v382_v54  ;;  %v545_v19 = vmul.f32 %v3415_v13, %v392_v17 }
 0x16a   :  { %v579_v61 = vadd.f32 %v3420_v52, %v543_v59  ;;  %v581_v23 = vadd.f32 %v3420_v52, %v545_v19 }
 0x16b   :  { %v387_v33 = vpop.permute.xlu1 %386 }
 0x16c   :  { %v611_v24 = vmax.f32 %v579_v61, 0.0  ;;  %v544_v4 = vmul.f32 %v3415_v13, %v387_v33  ;;  %v613_v28 = vmax.f32 %v581_v23, 0.0 }
 0x16e   :  { %v580_v6 = vadd.f32 %v3420_v52, %v544_v4  ;;  %v647_v5 = vmul.f32 %v3429_v21, %v611_v24  ;;  %v649_v54 = vmul.f32 %v3429_v21, %v613_v28 }
 0x16f   :  { %v397_v29 = vpop.permute.xlu1 %396 }
 0x170   :  { %v612_v8 = vmax.f32 %v580_v6, 0.0  ;;  %v546_v30 = vmul.f32 %v3415_v13, %v397_v29  ;;  %v680_v7 = vsel %vm679_vm0, %v647_v5, 0.0  ;;  %v686_v5 = vsel %vm679_vm0, %v649_v54, 0.0 }
 0x171   :  { %681 = vadd.xlane.f32.xlu1 %v680_v7 }
 0x172   :  { %v582_v31 = vadd.f32 %v3420_v52, %v546_v30  ;;  %v648_v40 = vmul.f32 %v3429_v21, %v612_v8 }
 0x173   :  { %v402_v41 = vpop.permute.xlu1 %401  ;;  %v407_v2 = vpop.permute.xlu0 %406 }
 0x174   :  { %v614_v17 = vmax.f32 %v582_v31, 0.0  ;;  %v547_v59 = vmul.f32 %v3415_v13, %v402_v41  ;;  %v548_v19 = vmul.f32 %v3415_v13, %v407_v2  ;;  %v683_v61 = vsel %vm679_vm0, %v648_v40, 0.0 }
 0x175   :  { %684 = vadd.xlane.f32.xlu0 %v683_v61 }
 0x176   :  { %v583_v33 = vadd.f32 %v3420_v52, %v547_v59  ;;  %v584_v23 = vadd.f32 %v3420_v52, %v548_v19  ;;  %v650_v24 = vmul.f32 %v3429_v21, %v614_v17 }
 0x177   :  { %v412_v4 = vpop.permute.xlu1 %411  ;;  %v417_v6 = vpop.permute.xlu0 %416 }
 0x178   :  { %v615_v29 = vmax.f32 %v583_v33, 0.0  ;;  %v616_v28 = vmax.f32 %v584_v23, 0.0  ;;  %v549_v8 = vmul.f32 %v3415_v13, %v412_v4  ;;  %v550_v30 = vmul.f32 %v3415_v13, %v417_v6 }
 0x179   :  { %v689_v7 = vsel %vm679_vm0, %v650_v24, 0.0  ;;  %687 = vadd.xlane.f32.xlu0 %v686_v5 }
 0x17a   :  { %v585_v31 = vadd.f32 %v3420_v52, %v549_v8  ;;  %v586_v40 = vadd.f32 %v3420_v52, %v550_v30  ;;  %690 = vadd.xlane.f32.xlu1 %v689_v7  ;;  %v651_v41 = vmul.f32 %v3429_v21, %v615_v29  ;;  %v652_v2 = vmul.f32 %v3429_v21, %v616_v28  ;;  %v1220_v30 = vld [vmem:[%s4519_s4 + $0x18] sm:$0xff] }
 0x17b   :  { %v422_v17 = vpop.permute.xlu1 %421  ;;  %v427_v54 = vpop.permute.xlu0 %426  ;;  %2633 = vmatprep.subr.mxu1 %v1220_v30 }
 0x17c   :  { %v617_v59 = vmax.f32 %v585_v31, 0.0  ;;  %v618_v19 = vmax.f32 %v586_v40, 0.0  ;;  %v551_v61 = vmul.f32 %v3415_v13, %v422_v17  ;;  %v552_v33 = vmul.f32 %v3415_v13, %v427_v54  ;;  %2634 = vmatpush3.msra.mxu1 %v1220_v30  ;;  %v1219_v54 = vld [vmem:[%s4519_s4 + $0x10] sm:$0xff] }
 0x17d   :  { %v692_v23 = vsel %vm679_vm0, %v651_v41, 0.0  ;;  %v695_v24 = vsel %vm679_vm0, %v652_v2, 0.0  ;;  %2635 = vmatprep.subr.mxu1 %v1219_v54 }
 0x17e   :  { %v587_v4 = vadd.f32 %v3420_v52, %v551_v61  ;;  %v588_v6 = vadd.f32 %v3420_v52, %v552_v33  ;;  %693 = vadd.xlane.f32.xlu0 %v692_v23  ;;  %696 = vadd.xlane.f32.xlu1 %v695_v24  ;;  %v653_v5 = vmul.f32 %v3429_v21, %v617_v59 }
 0x17f   :  { %v432_v29 = vpop.permute.xlu1 %431  ;;  %v437_v28 = vpop.permute.xlu0 %436  ;;  %v654_v8 = vmul.f32 %v3429_v21, %v618_v19  ;;  %2636 = vmatpush3.msra.mxu1 %v1219_v54 }
 0x180   :  { %v619_v7 = vmax.f32 %v587_v4, 0.0  ;;  %v620_v31 = vmax.f32 %v588_v6, 0.0  ;;  %v553_v40 = vmul.f32 %v3415_v13, %v432_v29  ;;  %v554_v41 = vmul.f32 %v3415_v13, %v437_v28  ;;  %v1218_v4 = vld [vmem:[%s4519_s4 + $0x8] sm:$0xff] }
 0x181   :  { %v698_v2 = vsel %vm679_vm0, %v653_v5, 0.0  ;;  %v701_v17 = vsel %vm679_vm0, %v654_v8, 0.0  ;;  %2637 = vmatprep.subr.mxu1 %v1218_v4 }
 0x182   :  { %v589_v59 = vadd.f32 %v3420_v52, %v553_v40  ;;  %v590_v19 = vadd.f32 %v3420_v52, %v554_v41  ;;  %699 = vadd.xlane.f32.xlu0 %v698_v2  ;;  %702 = vadd.xlane.f32.xlu1 %v701_v17  ;;  %v655_v61 = vmul.f32 %v3429_v21, %v619_v7  ;;  %v1217_v7 = vld [vmem:[%s4519_s4] sm:$0xff] }
 0x183   :  { %v442_v33 = vpop.permute.xlu1 %441  ;;  %v447_v23 = vpop.permute.xlu0 %446  ;;  %v656_v24 = vmul.f32 %v3429_v21, %v620_v31  ;;  %2638 = vmatpush3.msra.mxu1 %v1218_v4 }
 0x184   :  { %v621_v6 = vmax.f32 %v589_v59, 0.0  ;;  %v622_v5 = vmax.f32 %v590_v19, 0.0  ;;  %v555_v29 = vmul.f32 %v3415_v13, %v442_v33  ;;  %v556_v28 = vmul.f32 %v3415_v13, %v447_v23  ;;  %2639 = vmatprep.subr.mxu1 %v1217_v7 }
 0x185   :  { %v704_v8 = vsel %vm679_vm0, %v655_v61, 0.0  ;;  %v707_v30 = vsel %vm679_vm0, %v656_v24, 0.0  ;;  %2640 = vmatpush3.msra.mxu1 %v1217_v7 }
 0x186   :  { %v591_v31 = vadd.f32 %v3420_v52, %v555_v29  ;;  %v592_v40 = vadd.f32 %v3420_v52, %v556_v28  ;;  %705 = vadd.xlane.f32.xlu0 %v704_v8  ;;  %708 = vadd.xlane.f32.xlu1 %v707_v30  ;;  %v657_v41 = vmul.f32 %v3429_v21, %v621_v6 }
 0x187   :  { %v452_v2 = vpop.permute.xlu1 %451  ;;  %v457_v17 = vpop.permute.xlu0 %456  ;;  %v658_v54 = vmul.f32 %v3429_v21, %v622_v5 }
 0x188   :  { %v623_v59 = vmax.f32 %v591_v31, 0.0  ;;  %v624_v19 = vmax.f32 %v592_v40, 0.0  ;;  %v557_v61 = vmul.f32 %v3415_v13, %v452_v2  ;;  %v558_v33 = vmul.f32 %v3415_v13, %v457_v17 }
 0x189   :  { %v710_v23 = vsel %vm679_vm0, %v657_v41, 0.0  ;;  %v713_v24 = vsel %vm679_vm0, %v658_v54, 0.0 }
 0x18a   :  { %v593_v29 = vadd.f32 %v3420_v52, %v557_v61  ;;  %v594_v6 = vadd.f32 %v3420_v52, %v558_v33  ;;  %711 = vadd.xlane.f32.xlu0 %v710_v23  ;;  %714 = vadd.xlane.f32.xlu1 %v713_v24  ;;  %v659_v4 = vmul.f32 %v3429_v21, %v623_v59 }
 0x18b   :  { %v462_v5 = vpop.permute.xlu1 %461  ;;  %v467_v28 = vpop.permute.xlu0 %466  ;;  %v660_v8 = vmul.f32 %v3429_v21, %v624_v19 }
 0x18c   :  { %v625_v30 = vmax.f32 %v593_v29, 0.0  ;;  %v626_v31 = vmax.f32 %v594_v6, 0.0  ;;  %v559_v40 = vmul.f32 %v3415_v13, %v462_v5  ;;  %v560_v41 = vmul.f32 %v3415_v13, %v467_v28 }
 0x18d   :  { %v716_v7 = vsel %vm679_vm0, %v659_v4, 0.0  ;;  %v719_v2 = vsel %vm679_vm0, %v660_v8, 0.0 }
 0x18e   :  { %v595_v17 = vadd.f32 %v3420_v52, %v559_v40  ;;  %v596_v54 = vadd.f32 %v3420_v52, %v560_v41  ;;  %717 = vadd.xlane.f32.xlu0 %v716_v7  ;;  %720 = vadd.xlane.f32.xlu1 %v719_v2  ;;  %v661_v59 = vmul.f32 %v3429_v21, %v625_v30 }
 0x18f   :  { %v472_v61 = vpop.permute.xlu1 %471  ;;  %v477_v19 = vpop.permute.xlu0 %476  ;;  %v662_v33 = vmul.f32 %v3429_v21, %v626_v31 }
 0x190   :  { %v627_v23 = vmax.f32 %v595_v17, 0.0  ;;  %v628_v24 = vmax.f32 %v596_v54, 0.0  ;;  %v561_v29 = vmul.f32 %v3415_v13, %v472_v61  ;;  %v562_v6 = vmul.f32 %v3415_v13, %v477_v19 }
 0x191   :  { %v722_v4 = vsel %vm679_vm0, %v661_v59, 0.0  ;;  %v725_v5 = vsel %vm679_vm0, %v662_v33, 0.0 }
 0x192   :  { %v597_v28 = vadd.f32 %v3420_v52, %v561_v29  ;;  %v598_v8 = vadd.f32 %v3420_v52, %v562_v6  ;;  %723 = vadd.xlane.f32.xlu0 %v722_v4  ;;  %726 = vadd.xlane.f32.xlu1 %v725_v5  ;;  %v663_v30 = vmul.f32 %v3429_v21, %v627_v23 }
 0x193   :  { %v482_v40 = vpop.permute.xlu1 %481  ;;  %v487_v31 = vpop.permute.xlu0 %486  ;;  %v664_v41 = vmul.f32 %v3429_v21, %v628_v24 }
 0x194   :  { %v629_v7 = vmax.f32 %v597_v28, 0.0  ;;  %v630_v2 = vmax.f32 %v598_v8, 0.0  ;;  %v563_v17 = vmul.f32 %v3415_v13, %v482_v40  ;;  %v564_v54 = vmul.f32 %v3415_v13, %v487_v31 }
 0x195   :  { %v728_v59 = vsel %vm679_vm0, %v663_v30, 0.0  ;;  %v731_v61 = vsel %vm679_vm0, %v664_v41, 0.0 }
 0x196   :  { %v599_v19 = vadd.f32 %v3420_v52, %v563_v17  ;;  %v600_v33 = vadd.f32 %v3420_v52, %v564_v54  ;;  %729 = vadd.xlane.f32.xlu0 %v728_v59  ;;  %732 = vadd.xlane.f32.xlu1 %v731_v61  ;;  %v665_v23 = vmul.f32 %v3429_v21, %v629_v7 }
 0x197   :  { %v492_v29 = vpop.permute.xlu1 %491  ;;  %v497_v24 = vpop.permute.xlu0 %496  ;;  %v666_v6 = vmul.f32 %v3429_v21, %v630_v2 }
 0x198   :  { %v631_v4 = vmax.f32 %v599_v19, 0.0  ;;  %v632_v5 = vmax.f32 %v600_v33, 0.0  ;;  %v565_v28 = vmul.f32 %v3415_v13, %v492_v29  ;;  %v566_v8 = vmul.f32 %v3415_v13, %v497_v24 }
 0x199   :  { %v734_v30 = vsel %vm679_vm0, %v665_v23, 0.0  ;;  %v737_v40 = vsel %vm679_vm0, %v666_v6, 0.0 }
 0x19a   :  { %v601_v31 = vadd.f32 %v3420_v52, %v565_v28  ;;  %v602_v41 = vadd.f32 %v3420_v52, %v566_v8  ;;  %735 = vadd.xlane.f32.xlu0 %v734_v30  ;;  %738 = vadd.xlane.f32.xlu1 %v737_v40  ;;  %v667_v7 = vmul.f32 %v3429_v21, %v631_v4 }
 0x19b   :  { %v502_v17 = vpop.permute.xlu1 %501  ;;  %v507_v2 = vpop.permute.xlu0 %506  ;;  %v668_v54 = vmul.f32 %v3429_v21, %v632_v5 }
 0x19c   :  { %v633_v59 = vmax.f32 %v601_v31, 0.0  ;;  %v634_v61 = vmax.f32 %v602_v41, 0.0  ;;  %v567_v19 = vmul.f32 %v3415_v13, %v502_v17  ;;  %v568_v33 = vmul.f32 %v3415_v13, %v507_v2 }
 0x19d   :  { %v740_v23 = vsel %vm679_vm0, %v667_v7, 0.0  ;;  %v743_v29 = vsel %vm679_vm0, %v668_v54, 0.0 }
 0x19e   :  { %v603_v24 = vadd.f32 %v3420_v52, %v567_v19  ;;  %v604_v6 = vadd.f32 %v3420_v52, %v568_v33  ;;  %741 = vadd.xlane.f32.xlu0 %v740_v23  ;;  %744 = vadd.xlane.f32.xlu1 %v743_v29  ;;  %v669_v4 = vmul.f32 %v3429_v21, %v633_v59 }
 0x19f   :  { %v512_v28 = vpop.permute.xlu1 %511  ;;  %v517_v5 = vpop.permute.xlu0 %516  ;;  %v670_v8 = vmul.f32 %v3429_v21, %v634_v61 }
 0x1a0   :  { %v635_v30 = vmax.f32 %v603_v24, 0.0  ;;  %v636_v40 = vmax.f32 %v604_v6, 0.0  ;;  %v569_v31 = vmul.f32 %v3415_v13, %v512_v28  ;;  %v570_v41 = vmul.f32 %v3415_v13, %v517_v5 }
 0x1a1   :  { %v746_v7 = vsel %vm679_vm0, %v669_v4, 0.0  ;;  %v749_v17 = vsel %vm679_vm0, %v670_v8, 0.0 }
 0x1a2   :  { %v605_v2 = vadd.f32 %v3420_v52, %v569_v31  ;;  %v606_v54 = vadd.f32 %v3420_v52, %v570_v41  ;;  %747 = vadd.xlane.f32.xlu0 %v746_v7  ;;  %750 = vadd.xlane.f32.xlu1 %v749_v17  ;;  %v671_v59 = vmul.f32 %v3429_v21, %v635_v30 }
 0x1a3   :  { %v522_v19 = vpop.permute.xlu1 %521  ;;  %v527_v61 = vpop.permute.xlu0 %526  ;;  %v672_v33 = vmul.f32 %v3429_v21, %v636_v40 }
 0x1a4   :  { %v637_v23 = vmax.f32 %v605_v2, 0.0  ;;  %v638_v29 = vmax.f32 %v606_v54, 0.0  ;;  %v571_v24 = vmul.f32 %v3415_v13, %v522_v19  ;;  %v572_v6 = vmul.f32 %v3415_v13, %v527_v61 }
 0x1a5   :  { %v752_v4 = vsel %vm679_vm0, %v671_v59, 0.0  ;;  %v755_v28 = vsel %vm679_vm0, %v672_v33, 0.0 }
 0x1a6   :  { %v607_v5 = vadd.f32 %v3420_v52, %v571_v24  ;;  %v608_v8 = vadd.f32 %v3420_v52, %v572_v6  ;;  %753 = vadd.xlane.f32.xlu0 %v752_v4  ;;  %756 = vadd.xlane.f32.xlu1 %v755_v28  ;;  %v673_v30 = vmul.f32 %v3429_v21, %v637_v23 }
 0x1a7   :  { %v532_v31 = vpop.permute.xlu1 %531  ;;  %v537_v40 = vpop.permute.xlu0 %536  ;;  %v674_v41 = vmul.f32 %v3429_v21, %v638_v29 }
 0x1a8   :  { %v639_v7 = vmax.f32 %v607_v5, 0.0  ;;  %v640_v17 = vmax.f32 %v608_v8, 0.0  ;;  %v573_v2 = vmul.f32 %v3415_v13, %v532_v31  ;;  %v574_v54 = vmul.f32 %v3415_v13, %v537_v40  ;;  %v3577_v31 = vld [vmem:[%s4516_s1 + $0x60] sm:$0xff]  ;;  %v3583_v40 = vpop.f32.mrf.mxu0 }
 0x1a9   :  { %v758_v59 = vsel %vm679_vm0, %v673_v30, 0.0  ;;  %v761_v19 = vsel %vm679_vm0, %v674_v41, 0.0  ;;  %v3571_v30 = vld [vmem:[%s4516_s1 + $0x50] sm:$0xff] }
 0x1aa   :  { %v609_v61 = vadd.f32 %v3420_v52, %v573_v2  ;;  %v610_v33 = vadd.f32 %v3420_v52, %v574_v54  ;;  %759 = vadd.xlane.f32.xlu0 %v758_v59  ;;  %762 = vadd.xlane.f32.xlu1 %v761_v19  ;;  %v675_v23 = vmul.f32 %v3429_v21, %v639_v7  ;;  %2733 = vrcp.f32 %v3571_v30  ;;  %v3585_v7 = vpop.f32.mrf.mxu0  ;;  %v2783_v2 = vld [vmem:[%s4516_s1 + $0x28] sm:$0xff]  ;;  %v2784_v59 = vld [vmem:[%s4516_s1 + $0x58] sm:$0xff] }
 0x1ab   :  { %v676_v29 = vmul.f32 %v3429_v21, %v640_v17  ;;  %2735 = vrcp.f32 %v3577_v31  ;;  %v3590_v17 = vld [vmem:[%s4516_s1 + $0x70] sm:$0xff]  ;;  %v2104_v54 = vmul.f32 %v2783_v2, %v2783_v2  ;;  %v3603_v19 = vld [vmem:[%s4516_s1 + $0x18] sm:$0xff]  ;;  %v3685_v27 = vpop.permute.xlu0 %1851  ;;  %v2110_v37 = vmul.f32 %v2784_v59, %v2784_v59 }
 0x1ac   :  { %v641_v24 = vmax.f32 %v609_v61, 0.0  ;;  %v642_v6 = vmax.f32 %v610_v33, 0.0  ;;  %v764_v4 = vsel %vm679_vm0, %v675_v23, 0.0  ;;  %v2102_v61 = vmul.f32 %v3603_v19, %v3603_v19  ;;  %v3607_v33 = vpop.f32.mrf.mxu0 }
 0x1ad   :  { %v767_v13 = vsel %vm679_vm0, %v676_v29, 0.0 }
 0x1ae   :  { %765 = vadd.xlane.f32.xlu0 %v764_v4  ;;  %768 = vadd.xlane.f32.xlu1 %v767_v13  ;;  %v677_v28 = vmul.f32 %v3429_v21, %v641_v24  ;;  %v678_v5 = vmul.f32 %v3429_v21, %v642_v6  ;;  %v2781_v21 = vld [vmem:[%s4516_s1 + $0x48] sm:$0xff]  ;;  %v3611_v24 = vpop.f32.mrf.mxu0  ;;  %v3616_v6 = vld [vmem:[%s4516_s1 + $0x80] sm:$0xff]  ;;  %v3623_v4 = vld [vmem:[%s4516_s1 + $0x38] sm:$0xff] }
 0x1af   :  { %2737 = vrcp.f32 %v2781_v21  ;;  %v2106_v13 = vmul.f32 %v3623_v4, %v3623_v4  ;;  %v3698_v3 = vpop.permute.xlu0 %1853 }
 0x1b0   :  { %v770_v52 = vsel %vm679_vm0, %v677_v28, 0.0  ;;  %v773_v8 = vsel %vm679_vm0, %v678_v5, 0.0  ;;  %2739 = vrcp.f32 %v3590_v17  ;;  %v3630_v28 = vld [vmem:[%s4516_s1 + $0x68] sm:$0xff]  ;;  %v3637_v5 = vld [vmem:[%s4516_s1 + $0x20] sm:$0xff] }
 0x1b1   :  { %2741 = vrcp.f32 %v2784_v59 }
 0x1b2   :  { %771 = vadd.xlane.f32.xlu0 %v770_v52  ;;  %774 = vadd.xlane.f32.xlu1 %v773_v8  ;;  %2743 = vrcp.f32 %v3616_v6  ;;  %v2103_v52 = vmul.f32 %v3637_v5, %v3637_v5  ;;  %v3641_v8 = vpop.f32.mrf.mxu0 }
 0x1b3   :  { %2745 = vrcp.f32 %v3630_v28 }
 0x1b7   :  { %v2734_v41 = vpop.eup %2733 }
 0x1b8   :  { %v2736_v23 = vpop.eup %2735 }
 0x1bc   :  { %v2738_v29 = vpop.eup %2737 }
 0x1c3   :  { %1863 = vrot.lane.b32.xlu1 %v2734_v41, %s2845_s26  ;;  %v2740_v41 = vpop.eup %2739 }
 0x1c4   :  { %v2742_v2 = vpop.eup %2741 }
 0x1c7   :  { %2269 = vrot.lane.b32.xlu1 %v2104_v54, %s2845_s26  ;;  %v3645_v54 = vpop.f32.mrf.mxu0 }
 0x1c8   :  { %2265 = vrot.lane.b32.xlu0 %v2102_v61, %s2845_s26  ;;  %v2108_v61 = vmul.f32 %v2781_v21, %v2781_v21  ;;  %v2744_v21 = vpop.eup %2743 }
 0x1cb   :  { %1867 = vrot.lane.b32.xlu1 %v2736_v23, %s2845_s26  ;;  %v3651_v23 = vld [vmem:[%s4516_s1 + $0x78] sm:$0xff] }
 0x1cc   :  { %1861 = vrot.lane.b32.xlu0 %v2738_v29, %s2845_s26  ;;  %2747 = vrcp.f32 %v3651_v23  ;;  %v3658_v29 = vld [vmem:[%s4516_s1 + $0x30] sm:$0xff] }
 0x1cf   :  { %2273 = vrot.lane.b32.xlu1 %v2106_v13, %s2845_s26  ;;  %v2105_v13 = vmul.f32 %v3658_v29, %v3658_v29 }
 0x1d0   :  { %2267 = vrot.lane.b32.xlu0 %v2103_v52, %s2845_s26  ;;  %v3662_v52 = vpop.f32.mrf.mxu0 }
 0x1d2   :  { %v3666_v15 = vpop.f32.mrf.mxu0 }
 0x1d3   :  { %1871 = vrot.lane.b32.xlu1 %v2740_v41, %s2845_s26  ;;  %v2746_v41 = vpop.eup %2745 }
 0x1d4   :  { %1865 = vrot.lane.b32.xlu0 %v2742_v2, %s2845_s26  ;;  %v2792_v2 = vld [vmem:[%s4516_s1 + $0x88] sm:$0xff] }
 0x1d5   :  { %2749 = vrcp.f32 %v2792_v2 }
 0x1d7   :  { %2277 = vrot.lane.b32.xlu1 %v2108_v61, %s2845_s26  ;;  %v2107_v61 = vmul.f32 %v3676_v11, %v3676_v11 }
 0x1d8   :  { %2271 = vrot.lane.b32.xlu0 %v2105_v13, %s2845_s26  ;;  %v3680_v13 = vpop.f32.mrf.mxu0 }
 0x1da   :  { %v3683_v0 = vpop.f32.mrf.mxu0 }
 0x1db   :  { %1875 = vrot.lane.b32.xlu1 %v2744_v21, %s2845_s26  ;;  %v2748_v21 = vpop.eup %2747 }
 0x1dc   :  { %1869 = vrot.lane.b32.xlu0 %v2746_v41, %s2845_s26  ;;  %v2109_v41 = vmul.f32 %v3571_v30, %v3571_v30  ;;  %v3690_v2 = vpop.f32.mrf.mxu0  ;;  %v2111_v30 = vmul.f32 %v3577_v31, %v3577_v31  ;;  %v1151_v31 = vsub.s32 4, %v3395_v44 }
 0x1de   :  { %v3694_v25 = vpop.f32.mrf.mxu0  ;;  %v3729_v14 = vrot.slane %v3405_v48, %v1151_v31 }
 0x1df   :  { %2281 = vrot.lane.b32.xlu1 %v2110_v37, %s2845_s26  ;;  %v814_v37 = vsub.s32 3, %v3395_v44 }
 0x1e0   :  { %2275 = vrot.lane.b32.xlu0 %v2107_v61, %s2845_s26  ;;  %v3696_v61 = vpop.permute.xlu1 %1855  ;;  %v3700_v34 = vpop.f32.mrf.mxu0 }
 0x1e2   :  { %v2750_v26 = vpop.eup %2749 }
 0x1e4   :  { %1873 = vrot.lane.b32.xlu0 %v2748_v21, %s2845_s26  ;;  %v3705_v21 = vpop.f32.mrf.mxu0  ;;  %v3707_v59 = vpop.permute.xlu1 %2261 }
 0x1e5   :  { %4570 = vst [vmem:[#allocation23_spill] sm:$0xff] %v3707_v59 }
 0x1e6   :  { %v3713_v22 = vpop.f32.mrf.mxu0 }
 0x1e8   :  { %2279 = vrot.lane.b32.xlu0 %v2109_v41, %s2845_s26  ;;  %v3709_v41 = vpop.permute.xlu0 %2259  ;;  %v3715_v20 = vpop.permute.xlu1 %1859 }
 0x1e9   :  { %4571 = vst [vmem:[#allocation24_spill] sm:$0xff] %v3709_v41  ;;  %4572 = vst [vmem:[#allocation25_spill] sm:$0xff] %v3715_v20  ;;  %v3723_v18 = vpop.f32.mrf.mxu0 }
 0x1eb   :  { %v3731_v57 = vpop.f32.mrf.mxu0 }
 0x1ec   :  { %1877 = vrot.lane.b32.xlu0 %v2750_v26, %s2845_s26  ;;  %v3717_v62 = vpop.permute.xlu0 %1857  ;;  %v3720_v26 = vrot.slane %v3405_v48, %v814_v37 }
 0x1ed   :  { %4573 = vst [vmem:[#allocation26_spill] sm:$0xff] %v3717_v62  ;;  %v3736_v51 = vpop.f32.mrf.mxu0 }
 0x1ef   :  { %v3743_v31 = vpop.f32.mrf.mxu0 }
 0x1f0   :  { %2283 = vrot.lane.b32.xlu0 %v2111_v30, %s2845_s26  ;;  %v3725_v16 = vpop.permute.xlu0 %2263 }
 0x1f1   :  { %4574 = vst [vmem:[#allocation27_spill] sm:$0xff] %v3725_v16 }
 0x1fa   :  { %v682_v60 = vpop.xlane.xlu1 %681 }
 0x1fb   :  { %v816_v30 = vmul.f32 %v3720_v26, %v682_v60 }
 0x1fd   :  { %v1023_v12 = vadd.f32 %v3585_v7, %v816_v30 }
 0x1fe   :  { %v685_v53 = vpop.xlane.xlu0 %684 }
 0x1ff   :  { %v817_v37 = vmul.f32 %v3720_v26, %v685_v53  ;;  %v1153_v10 = vadd.f32 %v3729_v14, %v1023_v12 }
 0x201   :  { %v1026_v41 = vadd.f32 %v3611_v24, %v817_v37  ;;  %v1185_v16 = vmax.f32 %v1153_v10, 0.0 }
 0x202   :  { %v688_v20 = vpop.xlane.xlu0 %687 }
 0x203   :  { %v1154_v60 = vadd.f32 %v3729_v14, %v1026_v41  ;;  %v691_v59 = vpop.xlane.xlu1 %690  ;;  %v818_v48 = vmul.f32 %v3720_v26, %v688_v20  ;;  %2641 = vmatprep.mubr.msk.f32.mxu1 %vm679_vm0, %v1185_v16 }
 0x204   :  { %v819_v7 = vmul.f32 %v3720_v26, %v691_v59  ;;  %v3752_v59 = vpop.f32.mrf.mxu0 }
 0x205   :  { %v1186_v53 = vmax.f32 %v1154_v60, 0.0  ;;  %v1031_v12 = vadd.f32 %v3583_v40, %v818_v48 }
 0x206   :  { %v1034_v30 = vadd.f32 %v3607_v33, %v819_v7 }
 0x207   :  { %v1155_v24 = vadd.f32 %v3729_v14, %v1031_v12  ;;  %v697_v10 = vpop.xlane.xlu1 %696  ;;  %v694_v37 = vpop.xlane.xlu0 %693  ;;  %2642 = vmatmul.mubr.msk.f32.vlgmr.msra.gmra.mxu1 %vm679_vm0, %v1186_v53 }
 0x208   :  { %v1156_v41 = vadd.f32 %v3729_v14, %v1034_v30  ;;  %v821_v20 = vmul.f32 %v3720_v26, %v697_v10  ;;  %v820_v16 = vmul.f32 %v3720_v26, %v694_v37 }
 0x209   :  { %v1187_v62 = vmax.f32 %v1155_v24, 0.0  ;;  %v3762_v24 = vpop.f32.mrf.mxu0 }
 0x20a   :  { %v1188_v60 = vmax.f32 %v1156_v41, 0.0  ;;  %v1042_v40 = vadd.f32 %v3666_v15, %v821_v20  ;;  %v1039_v33 = vadd.f32 %v3645_v54, %v820_v16 }
 0x20b   :  { %v703_v48 = vpop.xlane.xlu1 %702  ;;  %v700_v7 = vpop.xlane.xlu0 %699  ;;  %2644 = vmatprep.mubr.msk.f32.mxu1 %vm679_vm0, %v1187_v62 }
 0x20c   :  { %v1158_v53 = vadd.f32 %v3729_v14, %v1042_v40  ;;  %v1157_v12 = vadd.f32 %v3729_v14, %v1039_v33  ;;  %v823_v30 = vmul.f32 %v3720_v26, %v703_v48  ;;  %v822_v10 = vmul.f32 %v3720_v26, %v700_v7  ;;  %2645 = vmatmul.mubr.msk.f32.gmra.mxu1 %vm679_vm0, %v1188_v60  ;;  %v3771_v60 = vpop.f32.mrf.mxu0 }
 0x20e   :  { %v1190_v37 = vmax.f32 %v1158_v53, 0.0  ;;  %v1189_v15 = vmax.f32 %v1157_v12, 0.0  ;;  %v1050_v54 = vadd.f32 %v3662_v52, %v823_v30  ;;  %v1047_v41 = vadd.f32 %v3641_v8, %v822_v10 }
 0x20f   :  { %v709_v20 = vpop.xlane.xlu1 %708  ;;  %v706_v62 = vpop.xlane.xlu0 %705 }
 0x210   :  { %v1160_v16 = vadd.f32 %v3729_v14, %v1050_v54  ;;  %v1159_v40 = vadd.f32 %v3729_v14, %v1047_v41  ;;  %v825_v33 = vmul.f32 %v3720_v26, %v709_v20  ;;  %v824_v48 = vmul.f32 %v3720_v26, %v706_v62  ;;  %2647 = vmatprep.mubr.msk.f32.mxu1 %vm679_vm0, %v1189_v15  ;;  %v3781_v20 = vpop.f32.mrf.mxu0 }
 0x211   :  { %2648 = vmatmul.mubr.msk.f32.gmra.mxu1 %vm679_vm0, %v1190_v37 }
 0x212   :  { %v1192_v7 = vmax.f32 %v1160_v16, 0.0  ;;  %v1191_v52 = vmax.f32 %v1159_v40, 0.0  ;;  %v1058_v8 = vadd.f32 %v3694_v25, %v825_v33  ;;  %v1055_v53 = vadd.f32 %v3683_v0, %v824_v48 }
 0x213   :  { %v715_v12 = vpop.xlane.xlu1 %714  ;;  %v712_v30 = vpop.xlane.xlu0 %711 }
 0x214   :  { %v1162_v10 = vadd.f32 %v3729_v14, %v1058_v8  ;;  %v1161_v54 = vadd.f32 %v3729_v14, %v1055_v53  ;;  %v827_v41 = vmul.f32 %v3720_v26, %v715_v12  ;;  %v826_v15 = vmul.f32 %v3720_v26, %v712_v30  ;;  %2650 = vmatprep.mubr.msk.f32.mxu1 %vm679_vm0, %v1191_v52  ;;  %v1105_v53 = vpop.f32.mrf.mxu0 }
 0x215   :  { %2651 = vmatmul.mubr.msk.f32.gmra.mxu1 %vm679_vm0, %v1192_v7 }
 0x216   :  { %v1194_v37 = vmax.f32 %v1162_v10, 0.0  ;;  %v1193_v25 = vmax.f32 %v1161_v54, 0.0  ;;  %v1066_v0 = vadd.f32 %v3690_v2, %v827_v41  ;;  %v1063_v62 = vadd.f32 %v3680_v13, %v826_v15  ;;  %v3794_v30 = vpop.f32.mrf.mxu0 }
 0x217   :  { %v721_v16 = vpop.xlane.xlu1 %720  ;;  %v718_v40 = vpop.xlane.xlu0 %717 }
 0x218   :  { %v1164_v33 = vadd.f32 %v3729_v14, %v1066_v0  ;;  %v1163_v48 = vadd.f32 %v3729_v14, %v1063_v62  ;;  %v829_v8 = vmul.f32 %v3720_v26, %v721_v16  ;;  %v828_v52 = vmul.f32 %v3720_v26, %v718_v40  ;;  %2653 = vmatprep.mubr.msk.f32.mxu1 %vm679_vm0, %v1193_v25  ;;  %v3804_v16 = vpop.f32.mrf.mxu0 }
 0x219   :  { %2654 = vmatmul.mubr.msk.f32.gmra.mxu1 %vm679_vm0, %v1194_v37 }
 0x21a   :  { %v1196_v7 = vmax.f32 %v1164_v33, 0.0  ;;  %v1195_v12 = vmax.f32 %v1163_v48, 0.0  ;;  %v1074_v2 = vadd.f32 %v3723_v18, %v829_v8  ;;  %v1071_v13 = vadd.f32 %v3705_v21, %v828_v52 }
 0x21b   :  { %v727_v10 = vpop.xlane.xlu1 %726  ;;  %v724_v54 = vpop.xlane.xlu0 %723 }
 0x21c   :  { %v1166_v41 = vadd.f32 %v3729_v14, %v1074_v2  ;;  %v1165_v15 = vadd.f32 %v3729_v14, %v1071_v13  ;;  %v831_v0 = vmul.f32 %v3720_v26, %v727_v10  ;;  %v830_v25 = vmul.f32 %v3720_v26, %v724_v54  ;;  %2656 = vmatprep.mubr.msk.f32.mxu1 %vm679_vm0, %v1195_v12  ;;  %v3814_v13 = vpop.f32.mrf.mxu0 }
 0x21d   :  { %2657 = vmatmul.mubr.msk.f32.gmra.mxu1 %vm679_vm0, %v1196_v7 }
 0x21e   :  { %v1198_v37 = vmax.f32 %v1166_v41, 0.0  ;;  %v1197_v18 = vmax.f32 %v1165_v15, 0.0  ;;  %v1082_v21 = vadd.f32 %v3713_v22, %v831_v0  ;;  %v1079_v62 = vadd.f32 %v3700_v34, %v830_v25 }
 0x21f   :  { %v733_v40 = vpop.xlane.xlu1 %732  ;;  %v730_v33 = vpop.xlane.xlu0 %729 }
 0x220   :  { %v1168_v48 = vadd.f32 %v3729_v14, %v1082_v21  ;;  %v1167_v8 = vadd.f32 %v3729_v14, %v1079_v62  ;;  %v833_v52 = vmul.f32 %v3720_v26, %v733_v40  ;;  %v832_v12 = vmul.f32 %v3720_v26, %v730_v33  ;;  %2659 = vmatprep.mubr.msk.f32.mxu1 %vm679_vm0, %v1197_v18  ;;  %v1121_v21 = vpop.f32.mrf.mxu0 }
 0x221   :  { %2660 = vmatmul.mubr.msk.f32.gmra.mxu1 %vm679_vm0, %v1198_v37 }
 0x222   :  { %v1200_v7 = vmax.f32 %v1168_v48, 0.0  ;;  %v1199_v22 = vmax.f32 %v1167_v8, 0.0  ;;  %v1090_v34 = vadd.f32 %v3752_v59, %v833_v52  ;;  %v1087_v2 = vadd.f32 %v3736_v51, %v832_v12 }
 0x223   :  { %v739_v10 = vpop.xlane.xlu1 %738  ;;  %v736_v54 = vpop.xlane.xlu0 %735 }
 0x224   :  { %v1170_v41 = vadd.f32 %v3729_v14, %v1090_v34  ;;  %v1169_v15 = vadd.f32 %v3729_v14, %v1087_v2  ;;  %v835_v0 = vmul.f32 %v3720_v26, %v739_v10  ;;  %v834_v25 = vmul.f32 %v3720_v26, %v736_v54  ;;  %2662 = vmatprep.mubr.msk.f32.mxu1 %vm679_vm0, %v1199_v22  ;;  %v3831_v22 = vpop.f32.mrf.mxu0 }
 0x225   :  { %2663 = vmatmul.mubr.msk.f32.gmra.mxu1 %vm679_vm0, %v1200_v7 }
 0x226   :  { %v1202_v37 = vmax.f32 %v1170_v41, 0.0  ;;  %v1201_v59 = vmax.f32 %v1169_v15, 0.0  ;;  %v1098_v51 = vadd.f32 %v3743_v31, %v835_v0  ;;  %v1095_v18 = vadd.f32 %v3731_v57, %v834_v25 }
 0x227   :  { %v745_v62 = vpop.xlane.xlu1 %744  ;;  %v742_v40 = vpop.xlane.xlu0 %741 }
 0x228   :  { %v1172_v33 = vadd.f32 %v3729_v14, %v1098_v51  ;;  %v1171_v48 = vadd.f32 %v3729_v14, %v1095_v18  ;;  %v837_v8 = vmul.f32 %v3720_v26, %v745_v62  ;;  %v836_v52 = vmul.f32 %v3720_v26, %v742_v40  ;;  %2665 = vmatprep.mubr.msk.f32.mxu1 %vm679_vm0, %v1201_v59 }
 0x229   :  { %2666 = vmatmul.mubr.msk.f32.gmra.mxu1 %vm679_vm0, %v1202_v37  ;;  %v1134_v37 = vpop.f32.mrf.mxu0 }
 0x22a   :  { %v1204_v12 = vmax.f32 %v1172_v33, 0.0  ;;  %v1203_v7 = vmax.f32 %v1171_v48, 0.0  ;;  %v1106_v31 = vadd.f32 %v1105_v53, %v837_v8  ;;  %v1103_v57 = vadd.f32 %v3771_v60, %v836_v52 }
 0x22b   :  { %v751_v34 = vpop.xlane.xlu1 %750  ;;  %v748_v2 = vpop.xlane.xlu0 %747 }
 0x22c   :  { %v1174_v10 = vadd.f32 %v3729_v14, %v1106_v31  ;;  %v1173_v54 = vadd.f32 %v3729_v14, %v1103_v57  ;;  %v839_v41 = vmul.f32 %v3720_v26, %v751_v34  ;;  %v838_v15 = vmul.f32 %v3720_v26, %v748_v2  ;;  %2668 = vmatprep.mubr.msk.f32.mxu1 %vm679_vm0, %v1203_v7  ;;  %v2632_v52 = vpop.f32.mrf.mxu0 }
 0x22d   :  { %2669 = vmatmul.mubr.msk.f32.gmra.mxu1 %vm679_vm0, %v1204_v12 }
 0x22e   :  { %v1206_v0 = vmax.f32 %v1174_v10, 0.0  ;;  %v1205_v53 = vmax.f32 %v1173_v54, 0.0  ;;  %v1114_v60 = vadd.f32 %v3781_v20, %v839_v41  ;;  %v1111_v25 = vadd.f32 %v3762_v24, %v838_v15  ;;  %v1137_v41 = vpop.f32.mrf.mxu0 }
 0x22f   :  { %v757_v59 = vpop.xlane.xlu1 %756  ;;  %v754_v51 = vpop.xlane.xlu0 %753 }
 0x230   :  { %v1176_v18 = vadd.f32 %v3729_v14, %v1114_v60  ;;  %v1175_v62 = vadd.f32 %v3729_v14, %v1111_v25  ;;  %v841_v40 = vmul.f32 %v3720_v26, %v757_v59  ;;  %v840_v33 = vmul.f32 %v3720_v26, %v754_v51  ;;  %2671 = vmatprep.mubr.msk.f32.mxu1 %vm679_vm0, %v1205_v53 }
 0x231   :  { %2672 = vmatmul.mubr.msk.f32.gmra.mxu1 %vm679_vm0, %v1206_v0 }
 0x232   :  { %v1208_v48 = vmax.f32 %v1176_v18, 0.0  ;;  %v1207_v8 = vmax.f32 %v1175_v62, 0.0  ;;  %v1119_v20 = vadd.f32 %v3804_v16, %v840_v33  ;;  %v1122_v24 = vadd.f32 %v1121_v21, %v841_v40 }
 0x233   :  { %v763_v12 = vpop.xlane.xlu1 %762  ;;  %v760_v7 = vpop.xlane.xlu0 %759 }
 0x234   :  { %v1177_v31 = vadd.f32 %v3729_v14, %v1119_v20  ;;  %v1178_v57 = vadd.f32 %v3729_v14, %v1122_v24  ;;  %v843_v34 = vmul.f32 %v3720_v26, %v763_v12  ;;  %v842_v2 = vmul.f32 %v3720_v26, %v760_v7  ;;  %2674 = vmatprep.mubr.msk.f32.mxu1 %vm679_vm0, %v1207_v8 }
 0x235   :  { %2675 = vmatmul.mubr.msk.f32.gmra.mxu1 %vm679_vm0, %v1208_v48 }
 0x236   :  { %v1209_v10 = vmax.f32 %v1177_v31, 0.0  ;;  %v1210_v54 = vmax.f32 %v1178_v57, 0.0  ;;  %v1130_v16 = vadd.f32 %v3814_v13, %v843_v34  ;;  %v1127_v21 = vadd.f32 %v3794_v30, %v842_v2 }
 0x237   :  { %v769_v15 = vpop.xlane.xlu1 %768  ;;  %v766_v0 = vpop.xlane.xlu0 %765 }
 0x238   :  { %v1180_v53 = vadd.f32 %v3729_v14, %v1130_v16  ;;  %v1179_v60 = vadd.f32 %v3729_v14, %v1127_v21  ;;  %v845_v25 = vmul.f32 %v3720_v26, %v769_v15  ;;  %v844_v59 = vmul.f32 %v3720_v26, %v766_v0  ;;  %2677 = vmatprep.mubr.msk.f32.mxu1 %vm679_vm0, %v1209_v10 }
 0x239   :  { %2678 = vmatmul.mubr.msk.f32.gmra.mxu1 %vm679_vm0, %v1210_v54  ;;  %v4576_v54 = vsub.s32 1, %v3395_v44 }
 0x23a   :  { %v1212_v51 = vmax.f32 %v1180_v53, 0.0  ;;  %v1211_v18 = vmax.f32 %v1179_v60, 0.0  ;;  %v1135_v13 = vadd.f32 %v1134_v37, %v844_v59  ;;  %v1138_v62 = vadd.f32 %v1137_v41, %v845_v25 }
 0x23b   :  { %v775_v30 = vpop.xlane.xlu1 %774  ;;  %v772_v40 = vpop.xlane.xlu0 %771 }
 0x23c   :  { %v1181_v33 = vadd.f32 %v3729_v14, %v1135_v13  ;;  %v1182_v48 = vadd.f32 %v3729_v14, %v1138_v62  ;;  %v847_v8 = vmul.f32 %v3720_v26, %v775_v30  ;;  %v846_v20 = vmul.f32 %v3720_v26, %v772_v40  ;;  %2680 = vmatprep.mubr.msk.f32.mxu1 %vm679_vm0, %v1211_v18  ;;  %v3878_v26 = vld [vmem:[%s4520_s5] sm:$0x7] }
 0x23d   :  { %2681 = vmatmul.mubr.msk.f32.gmra.mxu1 %vm679_vm0, %v1212_v51  ;;  %v3889_v16 = vrot.slane %v3878_v26, %v4576_v54 }
 0x23e   :  { %v1213_v24 = vmax.f32 %v1181_v33, 0.0  ;;  %v1214_v12 = vmax.f32 %v1182_v48, 0.0  ;;  %v1146_v7 = vadd.f32 %v2632_v52, %v847_v8  ;;  %v1143_v37 = vadd.f32 %v3831_v22, %v846_v20 }
 0x23f   :  { %v4575_v22 = vsub.s32 0, %v3395_v44 }
 0x240   :  { %v1184_v31 = vadd.f32 %v3729_v14, %v1146_v7  ;;  %v1183_v57 = vadd.f32 %v3729_v14, %v1143_v37  ;;  %2683 = vmatprep.mubr.msk.f32.mxu1 %vm679_vm0, %v1213_v24 }
 0x241   :  { %2684 = vmatmul.mubr.msk.f32.gmra.mxu1 %vm679_vm0, %v1214_v12  ;;  %v3883_v52 = vrot.slane %v3878_v26, %v4575_v22 }
 0x242   :  { %v1216_v34 = vmax.f32 %v1184_v31, 0.0  ;;  %v1215_v2 = vmax.f32 %v1183_v57, 0.0 }
 0x244   :  { %2686 = vmatprep.mubr.msk.f32.mxu1 %vm679_vm0, %v1215_v2 }
 0x245   :  { %2687 = vmatmul.mubr.msk.f32.gmra.mxu1 %vm679_vm0, %v1216_v34 }
 0x2c7   :  { %v2643_v14 = vpop.f32.mrf.mxu1 }
 0x2c8   :  { %v1393_v10 = vadd.f32 %v2643_v14, %v3883_v52 }
 0x2c9   :  { %v1387_v21 = vpop.f32.mrf.mxu1 }
 0x2ca   :  { %v1547_v41 = vmax.f32 %v1393_v10, 0.0  ;;  %v1388_v15 = vadd.f32 %v1387_v21, %v3883_v52 }
 0x2cc   :  { %v1583_v0 = vmul.f32 %v3889_v16, %v1547_v41  ;;  %v1546_v53 = vmax.f32 %v1388_v15, 0.0  ;;  %v2646_v60 = vpop.f32.mrf.mxu1 }
 0x2cd   :  { %v1403_v25 = vadd.f32 %v2646_v60, %v3883_v52 }
 0x2ce   :  { %v1582_v59 = vmul.f32 %v3889_v16, %v1546_v53  ;;  %v1397_v51 = vpop.f32.mrf.mxu1  ;;  %v1618_v18 = vsel %vm1614_vm1, %v1583_v0, 0.0 }
 0x2cf   :  { %v1549_v13 = vmax.f32 %v1403_v25, 0.0  ;;  %v1398_v62 = vadd.f32 %v1397_v51, %v3883_v52  ;;  %1619 = vadd.xlane.f32.xlu1 %v1618_v18 }
 0x2d0   :  { %v1615_v30 = vsel %vm1614_vm1, %v1582_v59, 0.0 }
 0x2d1   :  { %v1585_v40 = vmul.f32 %v3889_v16, %v1549_v13  ;;  %v1548_v33 = vmax.f32 %v1398_v62, 0.0  ;;  %v2649_v48 = vpop.f32.mrf.mxu1  ;;  %1616 = vadd.xlane.f32.xlu0 %v1615_v30 }
 0x2d2   :  { %v1413_v8 = vadd.f32 %v2649_v48, %v3883_v52 }
 0x2d3   :  { %v1584_v20 = vmul.f32 %v3889_v16, %v1548_v33  ;;  %v1407_v24 = vpop.f32.mrf.mxu1  ;;  %v1624_v12 = vsel %vm1614_vm1, %v1585_v40, 0.0 }
 0x2d4   :  { %v1551_v7 = vmax.f32 %v1413_v8, 0.0  ;;  %v1408_v37 = vadd.f32 %v1407_v24, %v3883_v52  ;;  %1625 = vadd.xlane.f32.xlu1 %v1624_v12 }
 0x2d5   :  { %v2652_v31 = vpop.f32.mrf.mxu1  ;;  %v1621_v57 = vsel %vm1614_vm1, %v1584_v20, 0.0 }
 0x2d6   :  { %v1587_v34 = vmul.f32 %v3889_v16, %v1551_v7  ;;  %v1550_v2 = vmax.f32 %v1408_v37, 0.0  ;;  %v1423_v22 = vadd.f32 %v2652_v31, %v3883_v52  ;;  %1622 = vadd.xlane.f32.xlu0 %v1621_v57 }
 0x2d7   :  { %v1417_v14 = vpop.f32.mrf.mxu1 }
 0x2d8   :  { %v1586_v10 = vmul.f32 %v3889_v16, %v1550_v2  ;;  %v1553_v54 = vmax.f32 %v1423_v22, 0.0  ;;  %v1418_v21 = vadd.f32 %v1417_v14, %v3883_v52  ;;  %v1630_v41 = vsel %vm1614_vm1, %v1587_v34, 0.0 }
 0x2d9   :  { %1631 = vadd.xlane.f32.xlu1 %v1630_v41  ;;  %v2655_v15 = vpop.f32.mrf.mxu1 }
 0x2da   :  { %v1589_v0 = vmul.f32 %v3889_v16, %v1553_v54  ;;  %v1552_v53 = vmax.f32 %v1418_v21, 0.0  ;;  %v1433_v60 = vadd.f32 %v2655_v15, %v3883_v52  ;;  %v1627_v25 = vsel %vm1614_vm1, %v1586_v10, 0.0 }
 0x2db   :  { %1628 = vadd.xlane.f32.xlu0 %v1627_v25  ;;  %v1427_v59 = vpop.f32.mrf.mxu1 }
 0x2dc   :  { %v1588_v51 = vmul.f32 %v3889_v16, %v1552_v53  ;;  %v1555_v18 = vmax.f32 %v1433_v60, 0.0  ;;  %v1428_v13 = vadd.f32 %v1427_v59, %v3883_v52  ;;  %v1636_v62 = vsel %vm1614_vm1, %v1589_v0, 0.0 }
 0x2dd   :  { %1637 = vadd.xlane.f32.xlu1 %v1636_v62  ;;  %v2658_v30 = vpop.f32.mrf.mxu1 }
 0x2de   :  { %v1591_v40 = vmul.f32 %v3889_v16, %v1555_v18  ;;  %v1554_v33 = vmax.f32 %v1428_v13, 0.0  ;;  %v1443_v48 = vadd.f32 %v2658_v30, %v3883_v52  ;;  %v1633_v8 = vsel %vm1614_vm1, %v1588_v51, 0.0 }
 0x2df   :  { %1634 = vadd.xlane.f32.xlu0 %v1633_v8  ;;  %v1437_v20 = vpop.f32.mrf.mxu1 }
 0x2e0   :  { %v1590_v24 = vmul.f32 %v3889_v16, %v1554_v33  ;;  %v1557_v12 = vmax.f32 %v1443_v48, 0.0  ;;  %v1438_v7 = vadd.f32 %v1437_v20, %v3883_v52  ;;  %v1642_v31 = vsel %vm1614_vm1, %v1591_v40, 0.0 }
 0x2e1   :  { %v2661_v37 = vpop.f32.mrf.mxu1 }
 0x2e2   :  { %v1593_v57 = vmul.f32 %v3889_v16, %v1557_v12  ;;  %v1556_v34 = vmax.f32 %v1438_v7, 0.0  ;;  %v1453_v2 = vadd.f32 %v2661_v37, %v3883_v52  ;;  %v1639_v22 = vsel %vm1614_vm1, %v1590_v24, 0.0 }
 0x2e3   :  { %1643 = vadd.xlane.f32.xlu0 %v1642_v31  ;;  %1640 = vadd.xlane.f32.xlu1 %v1639_v22  ;;  %v1447_v14 = vpop.f32.mrf.mxu1 }
 0x2e4   :  { %v1592_v10 = vmul.f32 %v3889_v16, %v1556_v34  ;;  %v1559_v54 = vmax.f32 %v1453_v2, 0.0  ;;  %v1448_v21 = vadd.f32 %v1447_v14, %v3883_v52  ;;  %v1648_v15 = vsel %vm1614_vm1, %v1593_v57, 0.0 }
 0x2e5   :  { %v2664_v41 = vpop.f32.mrf.mxu1 }
 0x2e6   :  { %v1595_v0 = vmul.f32 %v3889_v16, %v1559_v54  ;;  %v1558_v53 = vmax.f32 %v1448_v21, 0.0  ;;  %v1463_v60 = vadd.f32 %v2664_v41, %v3883_v52  ;;  %v1645_v25 = vsel %vm1614_vm1, %v1592_v10, 0.0 }
 0x2e7   :  { %1649 = vadd.xlane.f32.xlu1 %v1648_v15  ;;  %1646 = vadd.xlane.f32.xlu0 %v1645_v25  ;;  %v1457_v59 = vpop.f32.mrf.mxu1 }
 0x2e8   :  { %v1594_v51 = vmul.f32 %v3889_v16, %v1558_v53  ;;  %v1561_v18 = vmax.f32 %v1463_v60, 0.0  ;;  %v1458_v13 = vadd.f32 %v1457_v59, %v3883_v52  ;;  %v1654_v30 = vsel %vm1614_vm1, %v1595_v0, 0.0 }
 0x2e9   :  { %v2667_v62 = vpop.f32.mrf.mxu1 }
 0x2ea   :  { %v1597_v40 = vmul.f32 %v3889_v16, %v1561_v18  ;;  %v1560_v33 = vmax.f32 %v1458_v13, 0.0  ;;  %v1473_v48 = vadd.f32 %v2667_v62, %v3883_v52  ;;  %v1651_v8 = vsel %vm1614_vm1, %v1594_v51, 0.0 }
 0x2eb   :  { %1655 = vadd.xlane.f32.xlu1 %v1654_v30  ;;  %1652 = vadd.xlane.f32.xlu0 %v1651_v8  ;;  %v1467_v20 = vpop.f32.mrf.mxu1 }
 0x2ec   :  { %v1596_v24 = vmul.f32 %v3889_v16, %v1560_v33  ;;  %v1563_v12 = vmax.f32 %v1473_v48, 0.0  ;;  %v1468_v7 = vadd.f32 %v1467_v20, %v3883_v52  ;;  %v1660_v31 = vsel %vm1614_vm1, %v1597_v40, 0.0 }
 0x2ed   :  { %v2670_v37 = vpop.f32.mrf.mxu1 }
 0x2ee   :  { %v1599_v57 = vmul.f32 %v3889_v16, %v1563_v12  ;;  %v1562_v34 = vmax.f32 %v1468_v7, 0.0  ;;  %v1483_v2 = vadd.f32 %v2670_v37, %v3883_v52  ;;  %v1657_v22 = vsel %vm1614_vm1, %v1596_v24, 0.0 }
 0x2ef   :  { %1661 = vadd.xlane.f32.xlu1 %v1660_v31  ;;  %1658 = vadd.xlane.f32.xlu0 %v1657_v22  ;;  %v1477_v14 = vpop.f32.mrf.mxu1 }
 0x2f0   :  { %v1598_v10 = vmul.f32 %v3889_v16, %v1562_v34  ;;  %v1565_v54 = vmax.f32 %v1483_v2, 0.0  ;;  %v1478_v21 = vadd.f32 %v1477_v14, %v3883_v52  ;;  %v1666_v15 = vsel %vm1614_vm1, %v1599_v57, 0.0 }
 0x2f1   :  { %v2673_v41 = vpop.f32.mrf.mxu1 }
 0x2f2   :  { %v1601_v0 = vmul.f32 %v3889_v16, %v1565_v54  ;;  %v1564_v53 = vmax.f32 %v1478_v21, 0.0  ;;  %v1493_v60 = vadd.f32 %v2673_v41, %v3883_v52  ;;  %v1663_v25 = vsel %vm1614_vm1, %v1598_v10, 0.0 }
 0x2f3   :  { %1667 = vadd.xlane.f32.xlu1 %v1666_v15  ;;  %1664 = vadd.xlane.f32.xlu0 %v1663_v25  ;;  %v1487_v59 = vpop.f32.mrf.mxu1 }
 0x2f4   :  { %v1600_v51 = vmul.f32 %v3889_v16, %v1564_v53  ;;  %v1567_v18 = vmax.f32 %v1493_v60, 0.0  ;;  %v1488_v13 = vadd.f32 %v1487_v59, %v3883_v52  ;;  %v1672_v30 = vsel %vm1614_vm1, %v1601_v0, 0.0  ;;  %v3969_v59 = vld [vmem:[%s4516_s1 + $0x90] sm:$0xff] }
 0x2f5   :  { %v2676_v62 = vpop.f32.mrf.mxu1  ;;  %2751 = vrcp.f32 %v3969_v59 }
 0x2f6   :  { %v1603_v40 = vmul.f32 %v3889_v16, %v1567_v18  ;;  %v1566_v33 = vmax.f32 %v1488_v13, 0.0  ;;  %v1503_v48 = vadd.f32 %v2676_v62, %v3883_v52  ;;  %v1669_v8 = vsel %vm1614_vm1, %v1600_v51, 0.0 }
 0x2f7   :  { %1673 = vadd.xlane.f32.xlu1 %v1672_v30  ;;  %1670 = vadd.xlane.f32.xlu0 %v1669_v8  ;;  %v1497_v20 = vpop.f32.mrf.mxu1 }
 0x2f8   :  { %v1602_v24 = vmul.f32 %v3889_v16, %v1566_v33  ;;  %v1569_v12 = vmax.f32 %v1503_v48, 0.0  ;;  %v1498_v7 = vadd.f32 %v1497_v20, %v3883_v52  ;;  %v1678_v31 = vsel %vm1614_vm1, %v1603_v40, 0.0 }
 0x2f9   :  { %v2679_v37 = vpop.f32.mrf.mxu1 }
 0x2fa   :  { %v1605_v57 = vmul.f32 %v3889_v16, %v1569_v12  ;;  %v1568_v34 = vmax.f32 %v1498_v7, 0.0  ;;  %v1513_v2 = vadd.f32 %v2679_v37, %v3883_v52  ;;  %v1675_v22 = vsel %vm1614_vm1, %v1602_v24, 0.0 }
 0x2fb   :  { %1679 = vadd.xlane.f32.xlu1 %v1678_v31  ;;  %1676 = vadd.xlane.f32.xlu0 %v1675_v22  ;;  %v1507_v14 = vpop.f32.mrf.mxu1 }
 0x2fc   :  { %v1604_v10 = vmul.f32 %v3889_v16, %v1568_v34  ;;  %v1571_v54 = vmax.f32 %v1513_v2, 0.0  ;;  %v1508_v21 = vadd.f32 %v1507_v14, %v3883_v52  ;;  %v1684_v15 = vsel %vm1614_vm1, %v1605_v57, 0.0 }
 0x2fd   :  { %v2682_v41 = vpop.f32.mrf.mxu1 }
 0x2fe   :  { %v1607_v0 = vmul.f32 %v3889_v16, %v1571_v54  ;;  %v1570_v53 = vmax.f32 %v1508_v21, 0.0  ;;  %v1523_v60 = vadd.f32 %v2682_v41, %v3883_v52  ;;  %v1681_v25 = vsel %vm1614_vm1, %v1604_v10, 0.0 }
 0x2ff   :  { %1685 = vadd.xlane.f32.xlu1 %v1684_v15  ;;  %1682 = vadd.xlane.f32.xlu0 %v1681_v25  ;;  %v1517_v51 = vpop.f32.mrf.mxu1 }
 0x300   :  { %v1606_v18 = vmul.f32 %v3889_v16, %v1570_v53  ;;  %v1573_v13 = vmax.f32 %v1523_v60, 0.0  ;;  %v1518_v62 = vadd.f32 %v1517_v51, %v3883_v52  ;;  %v1690_v30 = vsel %vm1614_vm1, %v1607_v0, 0.0  ;;  %v3994_v0 = vld [vmem:[%s4516_s1 + $0x98] sm:$0xff] }
 0x301   :  { %v2685_v40 = vpop.f32.mrf.mxu1  ;;  %2753 = vrcp.f32 %v3994_v0 }
 0x302   :  { %v1609_v33 = vmul.f32 %v3889_v16, %v1573_v13  ;;  %v1572_v48 = vmax.f32 %v1518_v62, 0.0  ;;  %v1533_v8 = vadd.f32 %v2685_v40, %v3883_v52  ;;  %v1687_v20 = vsel %vm1614_vm1, %v1606_v18, 0.0  ;;  %v2752_v51 = vpop.eup %2751 }
 0x303   :  { %1688 = vadd.xlane.f32.xlu0 %v1687_v20  ;;  %v1527_v24 = vpop.f32.mrf.mxu1  ;;  %v2112_v62 = vmul.f32 %v3630_v28, %v3630_v28  ;;  %v4022_v20 = vpop.permute.xlu1 %1863 }
 0x304   :  { %v1608_v12 = vmul.f32 %v3889_v16, %v1572_v48  ;;  %v1575_v7 = vmax.f32 %v1533_v8, 0.0  ;;  %v1528_v37 = vadd.f32 %v1527_v24, %v3883_v52  ;;  %v3981_v31 = vsel %vm1614_vm1, %v1609_v33, 0.0 }
 0x305   :  { %v2688_v57 = vpop.f32.mrf.mxu1  ;;  %v2113_v33 = vmul.f32 %v3590_v17, %v3590_v17  ;;  %v4035_v17 = vld [vmem:[%s4516_s1 + $0xa0] sm:$0xff] }
 0x306   :  { %v1611_v34 = vmul.f32 %v3889_v16, %v1575_v7  ;;  %v1574_v2 = vmax.f32 %v1528_v37, 0.0  ;;  %v1543_v22 = vadd.f32 %v2688_v57, %v3883_v52  ;;  %v1693_v14 = vsel %vm1614_vm1, %v1608_v12, 0.0 }
 0x307   :  { %v1537_v10 = vpop.f32.mrf.mxu1  ;;  %v4026_v28 = vpop.permute.xlu1 %2269  ;;  %2755 = vrcp.f32 %v4035_v17 }
 0x308   :  { %v1610_v54 = vmul.f32 %v3889_v16, %v1574_v2  ;;  %v1577_v21 = vmax.f32 %v1543_v22, 0.0  ;;  %v1538_v41 = vadd.f32 %v1537_v10, %v3883_v52  ;;  %v3989_v15 = vsel %vm1614_vm1, %v1611_v34, 0.0  ;;  %v4047_v2 = vld [vmem:[%s4516_s1 + $0xa8] sm:$0xff] }
 0x309   :  { %4578 = vst [vmem:[#allocation29_spill] sm:$0xff] %v4047_v2  ;;  %2757 = vrcp.f32 %v4047_v2 }
 0x30a   :  { %v1613_v53 = vmul.f32 %v3889_v16, %v1577_v21  ;;  %v1576_v60 = vmax.f32 %v1538_v41, 0.0  ;;  %v3999_v25 = vsel %vm1614_vm1, %v1610_v54, 0.0 }
 0x30b   :  { %v4030_v7 = vpop.permute.xlu1 %1867 }
 0x30c   :  { %v1612_v18 = vmul.f32 %v3889_v16, %v1576_v60  ;;  %v4003_v52 = vsel %vm1614_vm1, %v1613_v53, 0.0  ;;  %v4015_v16 = vpop.permute.xlu0 %2265  ;;  %v2798_v60 = vld [vmem:[%s4516_s1 + $0x8] sm:$0xff] }
 0x30d   :  { %4577 = vst [vmem:[#allocation28_spill] sm:$0xff] %v4003_v52 }
 0x30e   :  { %v4006_v13 = vsel %vm1614_vm1, %v1612_v18, 0.0  ;;  %v2754_v40 = vpop.eup %2753 }
 0x30f   :  { %v4040_v57 = vpop.permute.xlu1 %2273 }
 0x310   :  { %1879 = vrot.lane.b32.xlu1 %v2752_v51, %s2845_s26  ;;  %v4018_v48 = vpop.permute.xlu0 %1861  ;;  %v1972_v51 = vsub.f32 %v3249_v58, %v2798_v60  ;;  %v4580_v60 = vsub.s32 2, %v3395_v44 }
 0x314   :  { %2285 = vrot.lane.b32.xlu1 %v2112_v62, %s2845_s26  ;;  %v4020_v8 = vpop.permute.xlu0 %2267  ;;  %v2756_v22 = vpop.eup %2755  ;;  %v2799_v62 = vld [vmem:[%s4516_s1] sm:$0xff] }
 0x316   :  { %v2758_v41 = vpop.eup %2757 }
 0x318   :  { %v4024_v24 = vpop.permute.xlu0 %1865 }
 0x319   :  { %1881 = vrot.lane.b32.xlu0 %v2754_v40, %s2845_s26  ;;  %v1971_v40 = vsub.f32 %v3240_v55, %v2799_v62  ;;  %v4095_v55 = vld [vmem:[%s4516_s1 + $0xb0] sm:$0xff]  ;;  %v1979_v62 = vsub.f32 %v3279_v39, %v3676_v11  ;;  %v2806_v39 = vld [vmem:[%s4516_s1 + $0x58] sm:$0xff] }
 0x31a   :  { %4581 = vst [vmem:[#allocation31_spill] sm:$0xff] %v4095_v55  ;;  %2759 = vrcp.f32 %v4095_v55  ;;  %v1982_v11 = vsub.f32 %v3292_v46, %v2806_v39 }
 0x31b   :  { %v2011_v55 = vsub.f32 0.0, %v1979_v62 }
 0x31c   :  { %v4028_v12 = vpop.permute.xlu0 %2271  ;;  %v4143_v2 = vsub.f32 0.0, %v1982_v11 }
 0x31d   :  { %2287 = vrot.lane.b32.xlu0 %v2113_v33, %s2845_s26  ;;  %v2800_v33 = vld [vmem:[%s4516_s1 + $0x10] sm:$0xff] }
 0x320   :  { %v4038_v37 = vpop.permute.xlu0 %1869 }
 0x324   :  { %v4042_v34 = vpop.permute.xlu0 %2275 }
 0x328   :  { %v4052_v10 = vpop.permute.xlu0 %1873 }
 0x32c   :  { %v4059_v21 = vpop.permute.xlu0 %2279 }
 0x330   :  { %v4068_v18 = vpop.permute.xlu0 %1877 }
 0x331   :  { %4579 = vst [vmem:[#allocation30_spill] sm:$0xff] %v4068_v18  ;;  %v4090_v18 = vrot.slane %v3878_v26, %v4580_v60 }
 0x338   :  { %1691 = vadd.xlane.f32.xlu1 %v1690_v30  ;;  %v4050_v30 = vpop.permute.xlu1 %1871 }
 0x33c   :  { %1694 = vadd.xlane.f32.xlu0 %v1693_v14  ;;  %v2114_v14 = vmul.f32 %v3651_v23, %v3651_v23  ;;  %v4057_v54 = vpop.permute.xlu1 %2277  ;;  %v2115_v23 = vmul.f32 %v3616_v6, %v3616_v6  ;;  %v1975_v6 = vsub.f32 %v3264_v32, %v3637_v5  ;;  %v2003_v32 = vsub.f32 0.0, %v1971_v40  ;;  %v2803_v5 = vld [vmem:[%s4516_s1 + $0x28] sm:$0xff] }
 0x33d   :  { %v1976_v26 = vsub.f32 %v3268_v35, %v2803_v5  ;;  %v2804_v35 = vld [vmem:[%s4516_s1 + $0x48] sm:$0xff] }
 0x33e   :  { %v1980_v5 = vsub.f32 %v3284_v42, %v2804_v35 }
 0x340   :  { %v4062_v53 = vpop.permute.xlu1 %1875 }
 0x344   :  { %v4081_v58 = vpop.permute.xlu1 %2281 }
 0x349   :  { %1883 = vrot.lane.b32.xlu1 %v2756_v22, %s2845_s26  ;;  %v1973_v22 = vsub.f32 %v3243_v56, %v2800_v33  ;;  %v4098_v56 = vpop.permute.xlu0 %2283 }
 0x34b   :  { %v2005_v44 = vsub.f32 0.0, %v1973_v22  ;;  %v2007_v22 = vsub.f32 0.0, %v1975_v6 }
 0x34d   :  { %2289 = vrot.lane.b32.xlu1 %v2114_v14, %s2845_s26  ;;  %v2004_v14 = vsub.f32 0.0, %v1972_v51  ;;  %v1977_v51 = vsub.f32 %v3271_v36, %v3658_v29  ;;  %v2805_v36 = vld [vmem:[%s4516_s1 + $0x50] sm:$0xff]  ;;  %v2037_v39 = vmul.f32 %v2005_v44, %v3410_v1 }
 0x34f   :  { %v2009_v35 = vsub.f32 0.0, %v1977_v51  ;;  %v2069_v11 = vmul.f32 %v2037_v39, %v3410_v1 }
 0x352   :  { %1885 = vrot.lane.b32.xlu0 %v2758_v41, %s2845_s26  ;;  %v1974_v41 = vsub.f32 %v3260_v63, %v3603_v19  ;;  %v4104_v63 = vld [vmem:[%s4516_s1 + $0xb8] sm:$0xff]  ;;  %v2036_v19 = vmul.f32 %v2004_v14, %v3397_v45  ;;  %v2035_v14 = vmul.f32 %v2003_v32, %v3399_v9 }
 0x353   :  { %4582 = vst [vmem:[#allocation32_spill] sm:$0xff] %v4104_v63  ;;  %2761 = vrcp.f32 %v4104_v63  ;;  %v2012_v63 = vsub.f32 0.0, %v1980_v5  ;;  %v2808_v5 = vld [vmem:[%s4516_s1 + $0x70] sm:$0xff] }
 0x354   :  { %v2006_v40 = vsub.f32 0.0, %v1974_v41  ;;  %v2068_v42 = vmul.f32 %v2036_v19, %v3397_v45  ;;  %v2067_v46 = vmul.f32 %v2035_v14, %v3399_v9  ;;  %v2039_v14 = vmul.f32 %v2007_v22, %v3685_v27 }
 0x356   :  { %2291 = vrot.lane.b32.xlu0 %v2115_v23, %s2845_s26  ;;  %v1978_v23 = vsub.f32 %v3276_v38, %v3623_v4  ;;  %v1981_v38 = vsub.f32 %v3287_v43, %v2805_v36  ;;  %v2807_v4 = vld [vmem:[%s4516_s1 + $0x60] sm:$0xff]  ;;  %v2038_v6 = vmul.f32 %v2006_v40, %v3408_v50 }
 0x357   :  { %v1983_v29 = vsub.f32 %v3295_v47, %v2807_v4 }
 0x358   :  { %v1620_v33 = vpop.xlane.xlu1 %1619  ;;  %v2010_v36 = vsub.f32 0.0, %v1978_v23  ;;  %v2013_v19 = vsub.f32 0.0, %v1981_v38  ;;  %v1985_v38 = vsub.f32 %v3303_v49, %v2808_v5 }
 0x359   :  { %v1716_v60 = vadd.f32 %v4090_v18, %v1620_v33  ;;  %v2008_v33 = vsub.f32 0.0, %v1976_v26  ;;  %v4146_v40 = vsub.f32 0.0, %v1983_v29  ;;  %v2070_v26 = vmul.f32 %v2038_v6, %v3408_v50  ;;  %v4583_v6 = vld [vmem:[#allocation26_spill] sm:$0xff] }
 0x35a   :  { %v1617_v41 = vpop.xlane.xlu0 %1616  ;;  %v2042_v22 = vmul.f32 %v2010_v36, %v4583_v6 }
 0x35b   :  { %v1940_v32 = vmul.f32 %v3397_v45, %v1716_v60  ;;  %v1715_v43 = vadd.f32 %v4090_v18, %v1617_v41  ;;  %v2040_v44 = vmul.f32 %v2008_v33, %v3698_v3  ;;  %v4161_v33 = vpop.eup %2759 }
 0x35d   :  { %v2132_v52 = vsub.f32 %v1940_v32, %v2068_v42  ;;  %v1939_v47 = vmul.f32 %v3399_v9, %v1715_v43  ;;  %v1626_v4 = vpop.xlane.xlu1 %1625  ;;  %v2041_v42 = vmul.f32 %v2009_v35, %v3696_v61  ;;  %v2072_v35 = vmul.f32 %v2040_v44, %v3698_v3 }
 0x35e   :  { %v1718_v45 = vadd.f32 %v4090_v18, %v1626_v4 }
 0x35f   :  { %v2164_v51 = vmul.f32 0.5, %v2132_v52  ;;  %v2131_v23 = vsub.f32 %v1939_v47, %v2067_v46  ;;  %v1623_v62 = vpop.xlane.xlu0 %1622  ;;  %v4584_v46 = vld [vmem:[#allocation23_spill] sm:$0xff] }
 0x360   :  { %v1942_v9 = vmul.f32 %v3408_v50, %v1718_v45  ;;  %v1717_v60 = vadd.f32 %v4090_v18, %v1623_v62  ;;  %v4165_v45 = vpop.eup %2761  ;;  %v4586_v62 = vld [vmem:[#allocation24_spill] sm:$0xff] }
 0x361   :  { %v2196_v29 = vmul.f32 %v2164_v51, %v2132_v52  ;;  %v2163_v41 = vmul.f32 0.5, %v2131_v23  ;;  %v2071_v52 = vmul.f32 %v2039_v14, %v3685_v27  ;;  %v4585_v51 = vld [vmem:[#allocation25_spill] sm:$0xff] }
 0x362   :  { %v2134_v32 = vsub.f32 %v1942_v9, %v2070_v26  ;;  %v1941_v43 = vmul.f32 %v3410_v1, %v1717_v60  ;;  %v1632_v50 = vpop.xlane.xlu1 %1631  ;;  %v2043_v1 = vmul.f32 %v2011_v55, %v4585_v51 }
 0x363   :  { %v2356_v47 = vmul.f32 %v4584_v46, %v2196_v29  ;;  %v2195_v4 = vmul.f32 %v2163_v41, %v2131_v23  ;;  %v1720_v49 = vadd.f32 %v4090_v18, %v1632_v50  ;;  %v2074_v23 = vmul.f32 %v2042_v22, %v4583_v6 }
 0x364   :  { %v2166_v39 = vmul.f32 0.5, %v2134_v32  ;;  %v2133_v36 = vsub.f32 %v1941_v43, %v2069_v11  ;;  %v1629_v26 = vpop.xlane.xlu0 %1628  ;;  %v2045_v43 = vmul.f32 %v2013_v19, %v4022_v20 }
 0x365   :  { %v2355_v9 = vmul.f32 %v4586_v62, %v2195_v4  ;;  %v1944_v60 = vmul.f32 %v3698_v3, %v1720_v49  ;;  %v1719_v5 = vadd.f32 %v4090_v18, %v1629_v26  ;;  %v2389_v29 = vsel %vm2387_vm2, %v2356_v47, 0.0 }
 0x366   :  { %v2198_v41 = vmul.f32 %v2166_v39, %v2134_v32  ;;  %v2165_v50 = vmul.f32 0.5, %v2133_v36  ;;  %v1638_v14 = vpop.xlane.xlu1 %1637  ;;  %v2044_v3 = vmul.f32 %v2012_v63, %v4018_v48  ;;  %v2017_v39 = vsub.f32 0.0, %v1985_v38 }
 0x367   :  { %v2388_v44 = vsel %vm2387_vm2, %v2355_v9, 0.0  ;;  %v2136_v46 = vsub.f32 %v1944_v60, %v2072_v35  ;;  %v1943_v11 = vmul.f32 %v3685_v27, %v1719_v5  ;;  %v1722_v55 = vadd.f32 %v4090_v18, %v1638_v14  ;;  %v4587_v9 = vld [vmem:[#allocation27_spill] sm:$0xff] }
 0x368   :  { %v2390_v4 = vadd.f32 %v2389_v29, %v2388_v44  ;;  %v2197_v49 = vmul.f32 %v2165_v50, %v2133_v36  ;;  %v1635_v26 = vpop.xlane.xlu0 %1634  ;;  %v2073_v35 = vmul.f32 %v2041_v42, %v3696_v61  ;;  %v2358_v27 = vmul.f32 %v4015_v16, %v2198_v41 }
 0x369   :  { %v2168_v22 = vmul.f32 0.5, %v2136_v46  ;;  %v2135_v62 = vsub.f32 %v1943_v11, %v2071_v52  ;;  %v1946_v32 = vmul.f32 %v4583_v6, %v1722_v55  ;;  %v1721_v47 = vadd.f32 %v4090_v18, %v1635_v26 }
 0x36a   :  { %v2357_v60 = vmul.f32 %v4587_v9, %v2197_v49  ;;  %v2075_v36 = vmul.f32 %v2043_v1, %v4585_v51  ;;  %v2077_v52 = vmul.f32 %v2045_v43, %v4022_v20  ;;  %v2076_v6 = vmul.f32 %v2044_v3, %v4018_v48 }
 0x36b   :  { %v2200_v5 = vmul.f32 %v2168_v22, %v2136_v46  ;;  %v2167_v19 = vmul.f32 0.5, %v2135_v62  ;;  %v2138_v14 = vsub.f32 %v1946_v32, %v2074_v23  ;;  %v1945_v63 = vmul.f32 %v3696_v61, %v1721_v47 }
 0x36c   :  { %v2391_v29 = vsel %vm2387_vm2, %v2357_v60, 0.0  ;;  %v1641_v38 = vpop.xlane.xlu1 %1640  ;;  %v1644_v50 = vpop.xlane.xlu0 %1643  ;;  %v2046_v16 = vmul.f32 %v4143_v2, %v4024_v24  ;;  %v2393_v23 = vsel %vm2387_vm2, %v2358_v27, 0.0  ;;  %v2047_v49 = vmul.f32 %v4146_v40, %v4030_v7 }
 0x36d   :  { %v2392_v42 = vadd.f32 %v2391_v29, %v2390_v4  ;;  %v2199_v41 = vmul.f32 %v2167_v19, %v2135_v62  ;;  %v2170_v44 = vmul.f32 0.5, %v2138_v14  ;;  %v2137_v46 = vsub.f32 %v1945_v63, %v2073_v35 }
 0x36e   :  { %v1723_v61 = vadd.f32 %v4090_v18, %v1641_v38  ;;  %v1724_v1 = vadd.f32 %v4090_v18, %v1644_v50  ;;  %v2360_v11 = vmul.f32 %v4026_v28, %v2200_v5  ;;  %v2078_v32 = vmul.f32 %v2046_v16, %v4024_v24 }
 0x36f   :  { %v2394_v55 = vadd.f32 %v2393_v23, %v2392_v42  ;;  %v2359_v43 = vmul.f32 %v4020_v8, %v2199_v41  ;;  %v2202_v3 = vmul.f32 %v2170_v44, %v2138_v14  ;;  %v2169_v2 = vmul.f32 0.5, %v2137_v46 }
 0x370   :  { %v1947_v4 = vmul.f32 %v4585_v51, %v1723_v61  ;;  %v1948_v26 = vmul.f32 %v4018_v48, %v1724_v1  ;;  %v1650_v22 = vpop.xlane.xlu1 %1649  ;;  %v1647_v62 = vpop.xlane.xlu0 %1646  ;;  %v2397_v51 = vsel %vm2387_vm2, %v2360_v11, 0.0  ;;  %v2049_v44 = vmul.f32 %v2017_v39, %v4050_v30 }
 0x371   :  { %v2395_v47 = vsel %vm2387_vm2, %v2359_v43, 0.0  ;;  %v1726_v28 = vadd.f32 %v4090_v18, %v1650_v22  ;;  %v1725_v35 = vadd.f32 %v4090_v18, %v1647_v62  ;;  %1697 = vadd.xlane.f32.xlu1 %v3981_v31  ;;  %v2201_v27 = vmul.f32 %v2169_v2, %v2137_v46  ;;  %v2809_v31 = vld [vmem:[%s4516_s1 + $0x80] sm:$0xff] }
 0x372   :  { %v2396_v8 = vadd.f32 %v2395_v47, %v2394_v55  ;;  %v2139_v40 = vsub.f32 %v1947_v4, %v2075_v36  ;;  %v2140_v9 = vsub.f32 %v1948_v26, %v2076_v6  ;;  %v2362_v48 = vmul.f32 %v4040_v57, %v2202_v3  ;;  %v4588_v36 = vld [vmem:[#allocation7_spill] sm:$0xff]  ;;  %v2810_v3 = vld [vmem:[%s4516_s1 + $0x68] sm:$0xff] }
 0x373   :  { %v1950_v60 = vmul.f32 %v4024_v24, %v1726_v28  ;;  %v1949_v5 = vmul.f32 %v4022_v20, %v1725_v35  ;;  %v2361_v14 = vmul.f32 %v4028_v12, %v2201_v27  ;;  %v1987_v6 = vsub.f32 %v4588_v36, %v2809_v31 }
 0x374   :  { %v2398_v19 = vadd.f32 %v2397_v51, %v2396_v8  ;;  %v2171_v63 = vmul.f32 0.5, %v2139_v40  ;;  %v2172_v29 = vmul.f32 0.5, %v2140_v9  ;;  %v1656_v38 = vpop.xlane.xlu1 %1655  ;;  %v1653_v50 = vpop.xlane.xlu0 %1652  ;;  %v2079_v20 = vmul.f32 %v2047_v49, %v4030_v7  ;;  %v4589_v49 = vld [vmem:[#allocation5_spill] sm:$0xff] }
 0x375   :  { %v2142_v16 = vsub.f32 %v1950_v60, %v2078_v32  ;;  %v2141_v42 = vsub.f32 %v1949_v5, %v2077_v52  ;;  %v1727_v57 = vadd.f32 %v4090_v18, %v1653_v50  ;;  %1700 = vadd.xlane.f32.xlu0 %v3999_v25  ;;  %v2399_v24 = vsel %vm2387_vm2, %v2361_v14, 0.0 }
 0x376   :  { %v2203_v12 = vmul.f32 %v2171_v63, %v2139_v40  ;;  %v2204_v41 = vmul.f32 %v2172_v29, %v2140_v9  ;;  %v2400_v23 = vadd.f32 %v2399_v24, %v2398_v19  ;;  %v2401_v1 = vsel %vm2387_vm2, %v2362_v48, 0.0 }
 0x377   :  { %v2174_v46 = vmul.f32 0.5, %v2142_v16  ;;  %v2173_v61 = vmul.f32 0.5, %v2141_v42  ;;  %v1951_v55 = vmul.f32 %v4030_v7, %v1727_v57  ;;  %v1984_v39 = vsub.f32 %v4589_v49, %v2810_v3 }
 0x378   :  { %v2363_v11 = vmul.f32 %v4042_v34, %v2203_v12  ;;  %v2364_v52 = vmul.f32 %v4057_v54, %v2204_v41  ;;  %v4224_v25 = vpop.xlane.xlu1 %1661  ;;  %v1659_v43 = vpop.xlane.xlu0 %1658  ;;  %v2402_v2 = vadd.f32 %v2401_v1, %v2400_v23  ;;  %v2019_v22 = vsub.f32 0.0, %v1987_v6 }
 0x379   :  { %v2206_v4 = vmul.f32 %v2174_v46, %v2142_v16  ;;  %v2205_v26 = vmul.f32 %v2173_v61, %v2141_v42  ;;  %v2143_v34 = vsub.f32 %v1951_v55, %v2079_v20  ;;  %v1729_v54 = vadd.f32 %v4090_v18, %v1659_v43 }
 0x37a   :  { %v2403_v62 = vsel %vm2387_vm2, %v2363_v11, 0.0  ;;  %v2081_v7 = vmul.f32 %v2049_v44, %v4050_v30  ;;  %v2051_v35 = vmul.f32 %v2019_v22, %v4062_v53  ;;  %v2405_v8 = vsel %vm2387_vm2, %v2364_v52, 0.0  ;;  %v4590_v44 = vld [vmem:[#allocation9_spill] sm:$0xff] }
 0x37b   :  { %v2404_v32 = vadd.f32 %v2403_v62, %v2402_v2  ;;  %v2366_v47 = vmul.f32 %v4081_v58, %v2206_v4  ;;  %v2365_v28 = vmul.f32 %v4059_v21, %v2205_v26  ;;  %v2175_v27 = vmul.f32 0.5, %v2143_v34 }
 0x37c   :  { %v1953_v40 = vmul.f32 %v4050_v30, %v1729_v54  ;;  %v4238_v9 = vpop.xlane.xlu1 %1667  ;;  %v1665_v51 = vpop.xlane.xlu0 %1664  ;;  %v2016_v58 = vsub.f32 0.0, %v1984_v39  ;;  %v1728_v21 = vadd.f32 %v4090_v18, %v1656_v38  ;;  %v2083_v50 = vmul.f32 %v2051_v35, %v4062_v53  ;;  %v4255_v38 = vld [vmem:[%s4516_s1 + $0x88] sm:$0xff] }
 0x37d   :  { %v1731_v48 = vadd.f32 %v4090_v18, %v1665_v51  ;;  %v2406_v60 = vadd.f32 %v2405_v8, %v2404_v32  ;;  %v2407_v5 = vsel %vm2387_vm2, %v2365_v28, 0.0  ;;  %v2207_v19 = vmul.f32 %v2175_v27, %v2143_v34  ;;  %v4291_v8 = vld [vmem:[%s4516_s1 + $0xc0] sm:$0xff]  ;;  %v4298_v27 = vld [vmem:[%s4516_s1 + $0xc8] sm:$0xff] }
 0x37e   :  { %v2145_v14 = vsub.f32 %v1953_v40, %v2081_v7  ;;  %v2409_v6 = vsel %vm2387_vm2, %v2366_v47, 0.0  ;;  %v2048_v16 = vmul.f32 %v2016_v58, %v4038_v37  ;;  %v1989_v23 = vsub.f32 %v4590_v44, %v3969_v59  ;;  %v4591_v40 = vld [vmem:[#allocation6_spill] sm:$0xff] }
 0x37f   :  { %v1955_v63 = vmul.f32 %v4062_v53, %v1731_v48  ;;  %v2408_v29 = vadd.f32 %v2407_v5, %v2406_v60  ;;  %v2367_v36 = vmul.f32 %v4098_v56, %v2207_v19  ;;  %v2116_v53 = vmul.f32 %v4255_v38, %v4255_v38 }
 0x380   :  { %v4245_v31 = vpop.xlane.xlu1 %1673  ;;  %v1671_v30 = vpop.xlane.xlu0 %1670  ;;  %v1952_v56 = vmul.f32 %v4038_v37, %v1728_v21  ;;  %v2021_v11 = vsub.f32 0.0, %v1989_v23  ;;  %v2117_v52 = vmul.f32 %v3969_v59, %v3969_v59  ;;  %v2177_v26 = vmul.f32 0.5, %v2145_v14 }
 0x381   :  { %v2410_v42 = vadd.f32 %v2409_v6, %v2408_v29  ;;  %v2411_v57 = vsel %vm2387_vm2, %v2367_v36, 0.0  ;;  %v4260_v20 = vsub.f32 %v1955_v63, %v2083_v50  ;;  %v1733_v3 = vadd.f32 %v4090_v18, %v1671_v30  ;;  %v4327_v36 = vld [vmem:[%s4516_s1 + $0xd8] sm:$0xff] }
 0x382   :  { %1887 = vrot.lane.b32.xlu1 %v4161_v33, %s2845_s26  ;;  %v2080_v33 = vmul.f32 %v2048_v16, %v4038_v37  ;;  %v2209_v54 = vmul.f32 %v2177_v26, %v2145_v14  ;;  %2763 = vrcp.f32 %v4291_v8  ;;  %v1730_v5 = vadd.f32 %v4090_v18, %v4224_v25  ;;  %v4314_v14 = vld [vmem:[%s4516_s1 + $0xd0] sm:$0xff] }
 0x383   :  { %v2412_v24 = vadd.f32 %v2411_v57, %v2410_v42  ;;  %2765 = vrcp.f32 %v4298_v27  ;;  %v2118_v19 = vmul.f32 %v3994_v0, %v3994_v0  ;;  %v4592_v25 = vld [vmem:[#allocation11_spill] sm:$0xff] }
 0x384   :  { %v4263_v12 = vpop.xlane.xlu1 %1679  ;;  %v1677_v41 = vpop.xlane.xlu0 %1676  ;;  %v2144_v46 = vsub.f32 %v1952_v56, %v2080_v33  ;;  %2767 = vrcp.f32 %v4314_v14  ;;  %v1954_v58 = vmul.f32 %v4052_v10, %v1730_v5  ;;  %v1991_v63 = vsub.f32 %v4592_v25, %v4035_v17  ;;  %v4596_v5 = vld [vmem:[#allocation8_spill] sm:$0xff] }
 0x385   :  { %2769 = vrcp.f32 %v4327_v36  ;;  %v1735_v57 = vadd.f32 %v4090_v18, %v1677_v41 }
 0x386   :  { %2293 = vrot.lane.b32.xlu1 %v2116_v53, %s2845_s26  ;;  %v2176_v55 = vmul.f32 0.5, %v2144_v46  ;;  %v2023_v6 = vsub.f32 0.0, %v1991_v63  ;;  %v1732_v63 = vadd.f32 %v4090_v18, %v4238_v9  ;;  %v2126_v9 = vmul.f32 %v4327_v36, %v4327_v36 }
 0x388   :  { %v4269_v61 = vpop.xlane.xlu1 %1685  ;;  %v4271_v1 = vpop.xlane.xlu0 %1682  ;;  %v2208_v4 = vmul.f32 %v2176_v55, %v2144_v46 }
 0x38b   :  { %1889 = vrot.lane.b32.xlu0 %v4165_v45, %s2845_s26 }
 0x38c   :  { %v1880_v43 = vpop.permute.xlu1 %1879  ;;  %v4277_v37 = vpop.xlane.xlu0 %1688 }
 0x38d   :  { %v2053_v49 = vmul.f32 %v2021_v11, %v1880_v43  ;;  %v1957_v39 = vmul.f32 %v1880_v43, %v1733_v3 }
 0x38f   :  { %v2085_v2 = vmul.f32 %v2053_v49, %v1880_v43  ;;  %2295 = vrot.lane.b32.xlu0 %v2117_v52, %s2845_s26  ;;  %v2764_v48 = vpop.eup %2763  ;;  %v4593_v49 = vld [vmem:[#allocation29_spill] sm:$0xff] }
 0x390   :  { %v2286_v22 = vpop.permute.xlu1 %2285  ;;  %v4281_v62 = vpop.permute.xlu0 %1881 }
 0x391   :  { %v2368_v45 = vmul.f32 %v2286_v22, %v2208_v4  ;;  %v4283_v34 = vsub.f32 %v1957_v39, %v2085_v2  ;;  %v2766_v50 = vpop.eup %2765  ;;  %v2120_v39 = vmul.f32 %v4593_v49, %v4593_v49  ;;  %v4356_v22 = vld [vmem:[%s4516_s1 + $0xe8] sm:$0xff] }
 0x392   :  { %v2768_v46 = vpop.eup %2767 }
 0x393   :  { %v2413_v59 = vsel %vm2387_vm2, %v2368_v45, 0.0 }
 0x394   :  { %v2414_v7 = vadd.f32 %v2413_v59, %v2412_v24  ;;  %v2288_v32 = vpop.permute.xlu0 %2287  ;;  %v4339_v24 = vld [vmem:[%s4516_s1 + $0xe0] sm:$0xff] }
 0x395   :  { %v2369_v47 = vmul.f32 %v2288_v32, %v2209_v54  ;;  %2771 = vrcp.f32 %v4339_v24 }
 0x396   :  { %2773 = vrcp.f32 %v4356_v22 }
 0x397   :  { %v2415_v28 = vsel %vm2387_vm2, %v2369_v47, 0.0 }
 0x398   :  { %v2416_v35 = vadd.f32 %v2415_v28, %v2414_v7  ;;  %v4594_v7 = vld [vmem:[#allocation32_spill] sm:$0xff]  ;;  %v2123_v28 = vmul.f32 %v4291_v8, %v4291_v8 }
 0x399   :  { %v2122_v32 = vmul.f32 %v4594_v7, %v4594_v7 }
 0x3aa   :  { %1703 = vadd.xlane.f32.xlu1 %v3989_v15  ;;  %v2814_v15 = vld [vmem:[%s4516_s1 + $0x78] sm:$0xff] }
 0x3ab   :  { %v1986_v51 = vsub.f32 %v4591_v40, %v2814_v15  ;;  %v2124_v15 = vmul.f32 %v4298_v27, %v4298_v27  ;;  %v4376_v40 = vld [vmem:[%s4516_s1 + $0xf0] sm:$0xff] }
 0x3ac   :  { %2775 = vrcp.f32 %v4376_v40 }
 0x3ad   :  { %v2018_v60 = vsub.f32 0.0, %v1986_v51  ;;  %v2125_v51 = vmul.f32 %v4314_v14, %v4314_v14 }
 0x3ae   :  { %1706 = vadd.xlane.f32.xlu0 %v4006_v13 }
 0x3af   :  { %v2050_v13 = vmul.f32 %v2018_v60, %v4052_v10  ;;  %v2127_v60 = vmul.f32 %v4339_v24, %v4339_v24 }
 0x3b1   :  { %v2082_v21 = vmul.f32 %v2050_v13, %v4052_v10  ;;  %v2119_v10 = vmul.f32 %v4035_v17, %v4035_v17  ;;  %v2179_v17 = vmul.f32 0.5, %v4260_v20  ;;  %v1988_v13 = vsub.f32 %v4596_v5, %v4255_v38  ;;  %v4600_v5 = vld [vmem:[#allocation10_spill] sm:$0xff] }
 0x3b3   :  { %v2146_v29 = vsub.f32 %v1954_v58, %v2082_v21  ;;  %v2211_v3 = vmul.f32 %v2179_v17, %v4260_v20  ;;  %v2770_v20 = vpop.eup %2769  ;;  %v2129_v21 = vmul.f32 %v4376_v40, %v4376_v40  ;;  %v2020_v25 = vsub.f32 0.0, %v1988_v13 }
 0x3b4   :  { %v2772_v54 = vpop.eup %2771  ;;  %v1990_v13 = vsub.f32 %v4600_v5, %v3994_v0 }
 0x3b5   :  { %v2178_v16 = vmul.f32 0.5, %v2146_v29  ;;  %v2774_v47 = vpop.eup %2773 }
 0x3b7   :  { %v2210_v23 = vmul.f32 %v2178_v16, %v2146_v29  ;;  %v4598_v29 = vld [vmem:[#allocation30_spill] sm:$0xff] }
 0x3b8   :  { %v1956_v38 = vmul.f32 %v4598_v29, %v1732_v63 }
 0x3bb   :  { %1891 = vrot.lane.b32.xlu1 %v2764_v48, %s2845_s26  ;;  %v4385_v48 = vld [vmem:[%s4516_s1 + $0xf8] sm:$0xff]  ;;  %s2846_s1 = smov [#allocation2]  }
 0x3bc   :  { %2777 = vrcp.f32 %v4385_v48 }
 0x3bf   :  { %2297 = vrot.lane.b32.xlu1 %v2118_v19, %s2845_s26  ;;  %v4597_v19 = vld [vmem:[#allocation31_spill] sm:$0xff] }
 0x3c0   :  { %v2121_v58 = vmul.f32 %v4597_v19, %v4597_v19 }
 0x3c1   :  { %v4322_v30 = vpop.xlane.xlu1 %1691 }
 0x3c4   :  { %1893 = vrot.lane.b32.xlu0 %v2766_v50, %s2845_s26  ;;  %v2052_v50 = vmul.f32 %v2020_v25, %v4598_v29 }
 0x3c5   :  { %v1884_v42 = vpop.permute.xlu1 %1883  ;;  %v4333_v53 = vpop.xlane.xlu0 %1694 }
 0x3c6   :  { %v2055_v56 = vmul.f32 %v2023_v6, %v1884_v42  ;;  %v1959_v33 = vmul.f32 %v1884_v42, %v1735_v57  ;;  %v2776_v6 = vpop.eup %2775  ;;  %v2084_v16 = vmul.f32 %v2052_v50, %v4598_v29  ;;  %v4602_v50 = vld [vmem:[#allocation15_spill] sm:$0xff] }
 0x3c8   :  { %v2087_v44 = vmul.f32 %v2055_v56, %v1884_v42  ;;  %2299 = vrot.lane.b32.xlu0 %v2119_v10, %s2845_s26  ;;  %v4599_v42 = vld [vmem:[#allocation13_spill] sm:$0xff]  ;;  %v2148_v56 = vsub.f32 %v1956_v38, %v2084_v16 }
 0x3c9   :  { %v2290_v11 = vpop.permute.xlu1 %2289  ;;  %v4344_v52 = vpop.permute.xlu0 %1885  ;;  %v1993_v57 = vsub.f32 %v4599_v42, %v4597_v19  ;;  %v2022_v19 = vsub.f32 0.0, %v1990_v13 }
 0x3ca   :  { %v2370_v41 = vmul.f32 %v2290_v11, %v2210_v23  ;;  %v4346_v55 = vsub.f32 %v1959_v33, %v2087_v44  ;;  %v2778_v10 = vpop.eup %2777  ;;  %v2180_v23 = vmul.f32 0.5, %v2148_v56  ;;  %v1737_v11 = vadd.f32 %v4090_v18, %v4271_v1 }
 0x3cb   :  { %v2025_v44 = vsub.f32 0.0, %v1993_v57  ;;  %v2130_v1 = vmul.f32 %v4385_v48, %v4385_v48 }
 0x3cc   :  { %v2417_v43 = vsel %vm2387_vm2, %v2370_v41, 0.0  ;;  %1895 = vrot.lane.b32.xlu0 %v2768_v46, %s2845_s26 }
 0x3cd   :  { %v2418_v2 = vadd.f32 %v2417_v43, %v2416_v35  ;;  %v2292_v4 = vpop.permute.xlu0 %2291  ;;  %v4595_v35 = vld [vmem:[#allocation28_spill] sm:$0xff]  ;;  %v2128_v43 = vmul.f32 %v4356_v22, %v4356_v22 }
 0x3ce   :  { %v2371_v26 = vmul.f32 %v2292_v4, %v2211_v3  ;;  %v2181_v4 = vmul.f32 0.5, %v4283_v34 }
 0x3d0   :  { %v2419_v45 = vsel %vm2387_vm2, %v2371_v26, 0.0  ;;  %2301 = vrot.lane.b32.xlu0 %v2120_v39, %s2845_s26 }
 0x3d1   :  { %v2420_v59 = vadd.f32 %v2419_v45, %v2418_v2  ;;  %v2212_v2 = vmul.f32 %v2180_v23, %v2148_v56 }
 0x3d4   :  { %1897 = vrot.lane.b32.xlu0 %v2770_v20, %s2845_s26 }
 0x3d8   :  { %1899 = vrot.lane.b32.xlu0 %v2772_v54, %s2845_s26 }
 0x3dc   :  { %2305 = vrot.lane.b32.xlu0 %v2122_v32, %s2845_s26 }
 0x3e0   :  { %1901 = vrot.lane.b32.xlu0 %v2774_v47, %s2845_s26  ;;  %v2213_v47 = vmul.f32 %v2181_v4, %v4283_v34 }
 0x3e3   :  { %1709 = vadd.xlane.f32.xlu1 %v4595_v35 }
 0x3e4   :  { %2307 = vrot.lane.b32.xlu0 %v2123_v28, %s2845_s26 }
 0x3e8   :  { %2309 = vrot.lane.b32.xlu0 %v2124_v15, %s2845_s26 }
 0x3ec   :  { %2311 = vrot.lane.b32.xlu0 %v2125_v51, %s2845_s26 }
 0x3f0   :  { %2315 = vrot.lane.b32.xlu0 %v2127_v60, %s2845_s26 }
 0x3f4   :  { %2303 = vrot.lane.b32.xlu1 %v2121_v58, %s2845_s26  ;;  %2319 = vrot.lane.b32.xlu0 %v2129_v21, %s2845_s26  ;;  %v2054_v58 = vmul.f32 %v2022_v19, %v4281_v62  ;;  %v1734_v21 = vadd.f32 %v4090_v18, %v4245_v31 }
 0x3f6   :  { %v2086_v25 = vmul.f32 %v2054_v58, %v4281_v62  ;;  %v1958_v34 = vmul.f32 %v4281_v62, %v1734_v21  ;;  %v1739_v62 = vadd.f32 %v4090_v18, %v4277_v37 }
 0x3f8   :  { %1903 = vrot.lane.b32.xlu1 %v2776_v6, %s2845_s26  ;;  %v2150_v29 = vsub.f32 %v1958_v34, %v2086_v25  ;;  %v1995_v6 = vsub.f32 %v4602_v50, %v4291_v8  ;;  %v4604_v25 = vld [vmem:[#allocation16_spill] sm:$0xff] }
 0x3f9   :  { %v1996_v34 = vsub.f32 %v4604_v25, %v4298_v27 }
 0x3fa   :  { %v4408_v33 = vpop.xlane.xlu1 %1697  ;;  %v2182_v16 = vmul.f32 0.5, %v2150_v29 }
 0x3fb   :  { %v2028_v50 = vsub.f32 0.0, %v1996_v34 }
 0x3fc   :  { %1905 = vrot.lane.b32.xlu1 %v2778_v10, %s2845_s26  ;;  %v2027_v10 = vsub.f32 0.0, %v1995_v6 }
 0x3fe   :  { %v1888_v17 = vpop.permute.xlu1 %1887  ;;  %v4413_v46 = vpop.xlane.xlu0 %1700 }
 0x3ff   :  { %v2057_v41 = vmul.f32 %v2025_v44, %v1888_v17  ;;  %v1961_v3 = vmul.f32 %v1888_v17, %v1737_v11 }
 0x400   :  { %2313 = vrot.lane.b32.xlu1 %v2126_v9, %s2845_s26  ;;  %v2214_v9 = vmul.f32 %v2182_v16, %v2150_v29  ;;  %v1738_v16 = vadd.f32 %v4090_v18, %v4269_v61  ;;  %v4608_v61 = vld [vmem:[#allocation20_spill] sm:$0xff] }
 0x401   :  { %v2089_v39 = vmul.f32 %v2057_v41, %v1888_v17  ;;  %v2183_v17 = vmul.f32 0.5, %v4346_v55 }
 0x402   :  { %v2294_v26 = vpop.permute.xlu1 %2293  ;;  %v4421_v45 = vpop.permute.xlu0 %1889 }
 0x403   :  { %v2372_v20 = vmul.f32 %v2294_v26, %v2212_v2  ;;  %v4423_v54 = vsub.f32 %v1961_v3, %v2089_v39  ;;  %v2215_v2 = vmul.f32 %v2183_v17, %v4346_v55  ;;  %v4603_v55 = vld [vmem:[#allocation14_spill] sm:$0xff]  ;;  %v2000_v17 = vsub.f32 %v4608_v61, %v4356_v22 }
 0x404   :  { %2317 = vrot.lane.b32.xlu1 %v2128_v43, %s2845_s26  ;;  %v1994_v58 = vsub.f32 %v4603_v55, %v4594_v7  ;;  %v4606_v7 = vld [vmem:[#allocation18_spill] sm:$0xff] }
 0x405   :  { %v2421_v32 = vsel %vm2387_vm2, %v2372_v20, 0.0 }
 0x406   :  { %v2422_v28 = vadd.f32 %v2421_v32, %v2420_v59  ;;  %v2296_v35 = vpop.permute.xlu0 %2295  ;;  %v4601_v59 = vld [vmem:[#allocation12_spill] sm:$0xff]  ;;  %v2026_v21 = vsub.f32 0.0, %v1994_v58  ;;  %v4610_v58 = vld [vmem:[#allocation22_spill] sm:$0xff] }
 0x407   :  { %v2373_v15 = vmul.f32 %v2296_v35, %v2213_v47  ;;  %v1992_v63 = vsub.f32 %v4601_v59, %v4593_v49  ;;  %v1736_v49 = vadd.f32 %v4090_v18, %v4263_v12  ;;  %v4605_v59 = vld [vmem:[#allocation17_spill] sm:$0xff] }
 0x408   :  { %2321 = vrot.lane.b32.xlu1 %v2130_v1, %s2845_s26  ;;  %v2058_v29 = vmul.f32 %v2026_v21, %v4421_v45  ;;  %s2469_s26 = sshll.u32 %s2846_s1, 4  ;;  %s2470_s26 = int_to_ptr.vmem [resolvable:$true] %s2469_s26 }
 0x409   :  { %v2423_v51 = vsel %vm2387_vm2, %v2373_v15, 0.0  ;;  %v2024_v0 = vsub.f32 0.0, %v1992_v63  ;;  %v1960_v43 = vmul.f32 %v4344_v52, %v1736_v49  ;;  %v1997_v63 = vsub.f32 %v4605_v59, %v4314_v14  ;;  %s2821_s15 = scalar_lea.vmem %s2470_s26, 16  ;;  %s2825_s5 = scalar_lea.vmem %s2470_s26, 32 }
 0x40a   :  { %v2424_v60 = vadd.f32 %v2423_v51, %v2422_v28  ;;  %v1740_v49 = vadd.f32 %v4090_v18, %v4322_v30  ;;  %v2185_v30 = vmul.f32 0.5, %v4423_v54  ;;  %p2822_p0 = scmp.ne.s32.totalorder %s2470_s26, %s2821_s15  ;;  %p2826_p1 = scmp.lt.s32.totalorder %s2470_s26, %s2470_s26 }
 0x40b   :  { %v2056_v42 = vmul.f32 %v2024_v0, %v4344_v52  ;;  %v2029_v0 = vsub.f32 0.0, %v1997_v63  ;;  %p2827_p2 = scmp.lt.s32.totalorder %s2825_s5, %s2821_s15 }
 0x40c   :  { %v2217_v55 = vmul.f32 %v2185_v30, %v4423_v54 }
 0x40d   :  { %v2088_v8 = vmul.f32 %v2056_v42, %v4344_v52  ;;  %p2828_p3 = por %p2827_p2, %p2826_p1 }
 0x40f   :  { %v2152_v4 = vsub.f32 %v1960_v43, %v2088_v8  ;;  %p2829_p4 = pnand %p2828_p3, %p2822_p0 }
 0x411   :  { %v2184_v32 = vmul.f32 0.5, %v2152_v4 }
 0x413   :  { %v2216_v35 = vmul.f32 %v2184_v32, %v2152_v4 }
 0x433   :  { %v4443_v38 = vpop.xlane.xlu1 %1703 }
 0x437   :  { %v1892_v57 = vpop.permute.xlu1 %1891  ;;  %v4446_v31 = vpop.xlane.xlu0 %1706 }
 0x438   :  { %v2059_v56 = vmul.f32 %v2027_v10, %v1892_v57  ;;  %v1963_v44 = vmul.f32 %v1892_v57, %v1739_v62  ;;  %v2090_v10 = vmul.f32 %v2058_v29, %v4421_v45  ;;  %v4607_v62 = vld [vmem:[#allocation19_spill] sm:$0xff] }
 0x439   :  { %v1999_v27 = vsub.f32 %v4607_v62, %v4339_v24 }
 0x43a   :  { %v2091_v23 = vmul.f32 %v2059_v56, %v1892_v57  ;;  %v1998_v57 = vsub.f32 %v4606_v7, %v4327_v36  ;;  %v1962_v56 = vmul.f32 %v4421_v45, %v1738_v16  ;;  %v1741_v36 = vadd.f32 %v4090_v18, %v4333_v53 }
 0x43b   :  { %v2298_v11 = vpop.permute.xlu1 %2297  ;;  %v1894_v41 = vpop.permute.xlu0 %1893  ;;  %v1743_v53 = vadd.f32 %v4090_v18, %v4413_v46 }
 0x43c   :  { %v2374_v3 = vmul.f32 %v2298_v11, %v2214_v9  ;;  %v4455_v39 = vsub.f32 %v1963_v44, %v2091_v23  ;;  %v2060_v42 = vmul.f32 %v2028_v50, %v1894_v41  ;;  %v2154_v8 = vsub.f32 %v1962_v56, %v2090_v10 }
 0x43d   :  { %v2030_v44 = vsub.f32 0.0, %v1998_v57  ;;  %v2031_v23 = vsub.f32 0.0, %v1999_v27  ;;  %v1964_v43 = vmul.f32 %v1894_v41, %v1740_v49  ;;  %v1744_v50 = vadd.f32 %v4090_v18, %v4443_v38 }
 0x43e   :  { %v2425_v37 = vsel %vm2387_vm2, %v2374_v3, 0.0  ;;  %v2092_v9 = vmul.f32 %v2060_v42, %v1894_v41  ;;  %v2187_v22 = vmul.f32 0.5, %v4455_v39 }
 0x43f   :  { %v2426_v12 = vadd.f32 %v2425_v37, %v2424_v60  ;;  %v2300_v26 = vpop.permute.xlu0 %2299 }
 0x440   :  { %v2375_v20 = vmul.f32 %v2300_v26, %v2215_v2  ;;  %v2186_v2 = vmul.f32 0.5, %v2154_v8  ;;  %v2156_v4 = vsub.f32 %v1964_v43, %v2092_v9  ;;  %v2219_v46 = vmul.f32 %v2187_v22, %v4455_v39 }
 0x442   :  { %v2427_v1 = vsel %vm2387_vm2, %v2375_v20, 0.0  ;;  %v1742_v20 = vadd.f32 %v4090_v18, %v4408_v33  ;;  %v2002_v33 = vsub.f32 %v4610_v58, %v4385_v48 }
 0x443   :  { %v2428_v47 = vadd.f32 %v2427_v1, %v2426_v12  ;;  %v1896_v28 = vpop.permute.xlu0 %1895  ;;  %v2032_v12 = vsub.f32 0.0, %v2000_v17 }
 0x444   :  { %v2061_v14 = vmul.f32 %v2029_v0, %v1896_v28  ;;  %v1965_v45 = vmul.f32 %v1896_v28, %v1741_v36  ;;  %v2034_v48 = vsub.f32 0.0, %v2002_v33 }
 0x446   :  { %v2093_v3 = vmul.f32 %v2061_v14, %v1896_v28  ;;  %v4609_v28 = vld [vmem:[#allocation21_spill] sm:$0xff] }
 0x447   :  { %v2302_v15 = vpop.permute.xlu0 %2301 }
 0x448   :  { %v2376_v51 = vmul.f32 %v2302_v15, %v2216_v35  ;;  %v2157_v1 = vsub.f32 %v1965_v45, %v2093_v3  ;;  %v2001_v15 = vsub.f32 %v4609_v28, %v4376_v40 }
 0x44a   :  { %v2429_v52 = vsel %vm2387_vm2, %v2376_v51, 0.0  ;;  %v2218_v51 = vmul.f32 %v2186_v2, %v2154_v8  ;;  %v2189_v63 = vmul.f32 0.5, %v2157_v1  ;;  %v2033_v10 = vsub.f32 0.0, %v2001_v15 }
 0x44b   :  { %v4461_v5 = vadd.f32 %v2429_v52, %v2428_v47  ;;  %v1898_v13 = vpop.permute.xlu0 %1897  ;;  %v2188_v52 = vmul.f32 0.5, %v2156_v4 }
 0x44c   :  { %v2062_v24 = vmul.f32 %v2030_v44, %v1898_v13  ;;  %v1966_v21 = vmul.f32 %v1898_v13, %v1742_v20  ;;  %v2221_v27 = vmul.f32 %v2189_v63, %v2157_v1 }
 0x44d   :  { %v2220_v54 = vmul.f32 %v2188_v52, %v2156_v4 }
 0x44e   :  { %v2094_v41 = vmul.f32 %v2062_v24, %v1898_v13  ;;  %v1745_v13 = vadd.f32 %v4090_v18, %v4446_v31 }
 0x44f   :  { %v1900_v19 = vpop.permute.xlu0 %1899 }
 0x450   :  { %v2063_v37 = vmul.f32 %v2031_v23, %v1900_v19  ;;  %v1967_v25 = vmul.f32 %v1900_v19, %v1743_v53  ;;  %v2158_v16 = vsub.f32 %v1966_v21, %v2094_v41 }
 0x452   :  { %v2095_v32 = vmul.f32 %v2063_v37, %v1900_v19  ;;  %v2190_v9 = vmul.f32 0.5, %v2158_v16 }
 0x453   :  { %v2306_v60 = vpop.permute.xlu0 %2305 }
 0x454   :  { %v2378_v59 = vmul.f32 %v2306_v60, %v2218_v51  ;;  %v2159_v40 = vsub.f32 %v1967_v25, %v2095_v32  ;;  %v2222_v37 = vmul.f32 %v2190_v9, %v2158_v16 }
 0x456   :  { %v2433_v62 = vsel %vm2387_vm2, %v2378_v59, 0.0  ;;  %v2191_v14 = vmul.f32 0.5, %v2159_v40 }
 0x457   :  { %v1902_v6 = vpop.permute.xlu0 %1901 }
 0x458   :  { %v2064_v47 = vmul.f32 %v2032_v12, %v1902_v6  ;;  %v1968_v19 = vmul.f32 %v1902_v6, %v1744_v50  ;;  %v2223_v3 = vmul.f32 %v2191_v14, %v2159_v40 }
 0x45a   :  { %v2096_v0 = vmul.f32 %v2064_v47, %v1902_v6 }
 0x45b   :  { %v2308_v11 = vpop.permute.xlu0 %2307 }
 0x45c   :  { %v2379_v42 = vmul.f32 %v2308_v11, %v2219_v46  ;;  %v2160_v8 = vsub.f32 %v1968_v19, %v2096_v0 }
 0x45e   :  { %v2435_v44 = vsel %vm2387_vm2, %v2379_v42, 0.0  ;;  %v2192_v2 = vmul.f32 0.5, %v2160_v8 }
 0x45f   :  { %v2310_v35 = vpop.permute.xlu0 %2309 }
 0x460   :  { %v2380_v38 = vmul.f32 %v2310_v35, %v2220_v54 }
 0x462   :  { %v2437_v11 = vsel %vm2387_vm2, %v2380_v38, 0.0 }
 0x463   :  { %v2312_v60 = vpop.permute.xlu0 %2311 }
 0x464   :  { %v2381_v23 = vmul.f32 %v2312_v60, %v2221_v27 }
 0x466   :  { %v2439_v4 = vsel %vm2387_vm2, %v2381_v23, 0.0 }
 0x467   :  { %v2316_v24 = vpop.permute.xlu0 %2315 }
 0x468   :  { %v2383_v53 = vmul.f32 %v2316_v24, %v2223_v3 }
 0x46a   :  { %v2443_v52 = vsel %vm2387_vm2, %v2383_v53, 0.0 }
 0x46b   :  { %v2320_v35 = vpop.permute.xlu0 %2319 }
 0x46c   :  { %v1710_v26 = vpop.xlane.xlu1 %1709 }
 0x470   :  { %v2304_v34 = vpop.permute.xlu1 %2303 }
 0x471   :  { %v2377_v29 = vmul.f32 %v2304_v34, %v2217_v55 }
 0x473   :  { %v2431_v7 = vsel %vm2387_vm2, %v2377_v29, 0.0 }
 0x474   :  { %v2432_v39 = vadd.f32 %v2431_v7, %v4461_v5  ;;  %v1904_v57 = vpop.permute.xlu1 %1903  ;;  %v1746_v5 = vadd.f32 %v4090_v18, %v1710_v26  ;;  %v2224_v26 = vmul.f32 %v2192_v2, %v2160_v8 }
 0x475   :  { %v2065_v56 = vmul.f32 %v2033_v10, %v1904_v57  ;;  %v1969_v61 = vmul.f32 %v1904_v57, %v1745_v13 }
 0x476   :  { %v2434_v49 = vadd.f32 %v2433_v62, %v2432_v39 }
 0x477   :  { %v2097_v17 = vmul.f32 %v2065_v56, %v1904_v57 }
 0x478   :  { %v2436_v31 = vadd.f32 %v2435_v44, %v2434_v49  ;;  %v1906_v6 = vpop.permute.xlu1 %1905 }
 0x479   :  { %v2066_v36 = vmul.f32 %v2034_v48, %v1906_v6  ;;  %v2161_v43 = vsub.f32 %v1969_v61, %v2097_v17  ;;  %v1970_v30 = vmul.f32 %v1906_v6, %v1746_v5 }
 0x47a   :  { %v2438_v45 = vadd.f32 %v2437_v11, %v2436_v31 }
 0x47b   :  { %v2098_v12 = vmul.f32 %v2066_v36, %v1906_v6  ;;  %v2193_v20 = vmul.f32 0.5, %v2161_v43 }
 0x47c   :  { %v2314_v22 = vpop.permute.xlu1 %2313  ;;  %v2440_v1 = vadd.f32 %v2439_v4, %v2438_v45 }
 0x47d   :  { %v2382_v41 = vmul.f32 %v2314_v22, %v2222_v37  ;;  %v2225_v32 = vmul.f32 %v2193_v20, %v2161_v43  ;;  %v2162_v47 = vsub.f32 %v1970_v30, %v2098_v12 }
 0x47f   :  { %v2441_v18 = vsel %vm2387_vm2, %v2382_v41, 0.0  ;;  %v2194_v28 = vmul.f32 0.5, %v2162_v47  ;;  %v2385_v55 = vmul.f32 %v2320_v35, %v2225_v32 }
 0x480   :  { %v2442_v15 = vadd.f32 %v2441_v18, %v2440_v1  ;;  %v2318_v51 = vpop.permute.xlu1 %2317 }
 0x481   :  { %v2384_v58 = vmul.f32 %v2318_v51, %v2224_v26  ;;  %v2226_v25 = vmul.f32 %v2194_v28, %v2162_v47  ;;  %v2447_v46 = vsel %vm2387_vm2, %v2385_v55, 0.0 }
 0x482   :  { %v2444_v33 = vadd.f32 %v2443_v52, %v2442_v15 }
 0x483   :  { %v2445_v21 = vsel %vm2387_vm2, %v2384_v58, 0.0 }
 0x484   :  { %v2446_v34 = vadd.f32 %v2445_v21, %v2444_v33  ;;  %v2322_v59 = vpop.permute.xlu1 %2321 }
 0x485   :  { %v2386_v63 = vmul.f32 %v2322_v59, %v2226_v25 }
 0x486   :  { %v2448_v29 = vadd.f32 %v2447_v46, %v2446_v34 }
 0x487   :  { %v2449_v50 = vsel %vm2387_vm2, %v2386_v63, 0.0 }
 0x488   :  { %v2450_v0 = vadd.f32 %v2449_v50, %v2448_v29 }
 0x48a   :  { %2451 = vadd.xlane.f32.xlu0 %v2450_v0 }
 0x513   :  { %v2452_v40 = vpop.xlane.xlu0 %2451 }
 0x514   :  { %v2453_v16 = vrot.slane %v2452_v40, 4 }
 0x516   :  { %v2454_v10 = vadd.f32 %v2453_v16, %v2452_v40 }
 0x518   :  { %v2455_v42 = vrot.slane %v2454_v10, 2 }
 0x51a   :  { %v2456_v54 = vadd.f32 %v2455_v42, %v2454_v10 }
 0x51c   :  { %v2457_v7 = vrot.slane %v2456_v54, 1 }
 0x51e   :  { %v2458_v48 = vadd.f32 %v2457_v7, %v2456_v54 }
 0x520   :  { %2689 = vpush %v2458_v48 }
 0x551   :  { %s2690_s14 = spop %2689 }
 0x552   :  { %v2460_v13 = vstv %s2690_s14 }
 0x553   :  { %2462 = vst.msk [vmem:[#allocation2] sm:$0x1] %vm2461_vm3, %v2460_v13 }
 0x554   :  { %2832 = shalt.err (!%p2829_p4)
}
 0x555   :  { %2472 = dma.vmem_to_hbm [thread:$0]  %s2470_s26, 16, %s4521_s6, [#allocation3]  }
 0x556   :  { %2841 = dma.done.wait [#allocation3], 16  }
 0x557   :  { %2842 = vsyncadd [#allocation3], 4294967280 }
 0x558   :  { %2476 = vsyncpa [#allocation3], 1 }

</bundles_post_ra>
